<compile_context>
chip_gen: v7x
topology: tpu7x:2x2x1
jax: 0.10.0
libtpu: 0.0.40
codegen_flags: <defaults>
</compile_context>

<pallas_src>
import jax
import jax.numpy as jnp
from jax.experimental import pallas as pl
from jax.experimental.pallas import tpu as pltpu


# ----------------------------------------------------------------------------
# Generation-aware helpers
# ----------------------------------------------------------------------------
def _tpu_vmem_capacity():
    """Physical per-core VMEM in bytes (falls back to the most restrictive gen)."""
    try:
        return int(pltpu.get_tpu_info().vmem_capacity_bytes)
    except Exception:
        return 64 << 20  # v7x per-TensorCore VMEM


def _vmem_limit_bytes():
    cap = _tpu_vmem_capacity()
    return int(min(cap * 3 // 4, 96 << 20))


def _const_spec(shape, index_map):
    """BlockSpec for per-call-constant weights: single-buffered to save VMEM."""
    try:
        return pl.BlockSpec(shape, index_map, pipeline_mode=pl.Buffered(1))
    except (TypeError, AttributeError):  # older jax without pipeline_mode
        return pl.BlockSpec(shape, index_map)


def _pad_lanes(a, mult=128):
    """Zero-pad the last dim to a multiple of `mult` (lane-dense, inert)."""
    pad = (-a.shape[-1]) % mult
    if pad == 0:
        return a
    return jnp.pad(a, [(0, 0)] * (a.ndim - 1) + [(0, pad)])


def _pick_news_block(n_total, L, E, F, A, nb_max=256):
    """Largest multiple-of-8 news block whose per-step VMEM footprint fits the
    current TPU generation, biased toward >= 4 grid steps (>= 2 per TensorCore
    on v7x) so both cores keep their input pipelines full."""
    budget = min(_tpu_vmem_capacity() // 2, 48 << 20)
    weight_bytes = (3 * E * F + F * A) * 2 + (F + 2 * A) * 4

    def step_bytes(nb):
        x_in = 2 * nb * L * E * 2        # double-buffered bf16 input block
        shifted = 2 * nb * L * E * 2     # x_prev / x_next shifted copies
        y_f32 = nb * L * F * 4           # conv accumulator (f32)
        y_bf16 = nb * L * F * 2          # bf16 copy feeding the attention matmul
        proj = nb * L * A * 4
        out = 2 * nb * F * 2             # double-buffered bf16 output block
        return x_in + shifted + y_f32 + y_bf16 + proj + out + weight_bytes

    nb = max(8, (min(nb_max, n_total) // 8) * 8)
    while nb > 8 and step_bytes(nb) > budget:
        nb -= 8
    while nb > 8 and pl.cdiv(n_total, nb) < 4:
        nb = max(8, ((nb // 2) // 8) * 8)
    return nb


# ----------------------------------------------------------------------------
# Kernel 1: batched news encoder
#   Conv1d(K=3, pad=1) as three accumulating MXU matmuls + ReLU
#   + additive-attention pooling.  Processes nb news items per grid step.
# ----------------------------------------------------------------------------
def _news_encoder_kernel(x_ref, w_ref, b_ref, aw_ref, ab_ref, aq_ref, o_ref):
    nb, L, E = x_ref.shape
    x2 = x_ref[...].reshape(nb * L, E)                 # (nb*L, E) bf16 tokens

    # Sequence position of each row inside its news item (conv boundary masks).
    l_idx = jax.lax.broadcasted_iota(jnp.int32, (nb * L, 1), 0) % L
    zero = jnp.zeros((), x2.dtype)
    zrow = jnp.zeros((1, E), x2.dtype)

    # Row-shifted inputs for the 3-tap "same" conv; item-boundary rows are
    # zeroed with a select so neighbouring items (or tail garbage) never leak.
    x_prev = jnp.where(l_idx == 0, zero,
                       jnp.concatenate([zrow, x2[:-1]], axis=0))
    x_next = jnp.where(l_idx == L - 1, zero,
                       jnp.concatenate([x2[1:], zrow], axis=0))

    # Conv1d(K=3, pad=1): three accumulating MXU matmuls (same FLOPs as im2col,
    # no (nb*L, 3E) staging buffer), f32 accumulation.
    y = jnp.dot(x_prev, w_ref[0], preferred_element_type=jnp.float32)
    y = y + jnp.dot(x2, w_ref[1], preferred_element_type=jnp.float32)
    y = y + jnp.dot(x_next, w_ref[2], preferred_element_type=jnp.float32)
    y = jnp.maximum(y + b_ref[...], 0.0)               # (nb*L, F) bias + ReLU

    # Additive attention: projection on the MXU (bf16 in / f32 acc).
    proj = jnp.tanh(jnp.dot(y.astype(jnp.bfloat16), aw_ref[...],
                            preferred_element_type=jnp.float32) + ab_ref[...])
    A = proj.shape[-1]
    # Score = <proj, q>: VPU broadcast-mul + lane reduce (no N=1 MXU matmul).
    scores = jnp.sum(proj.reshape(nb, L, A) * aq_ref[...], axis=-1)    # (nb, L)
    scores = scores - jnp.max(scores, axis=-1, keepdims=True)
    e = jnp.exp(scores)
    alpha = e * pl.reciprocal(jnp.sum(e, axis=-1, keepdims=True), approx=True)

    # Weighted pooling over the sequence; emit bf16 (halves the HBM round-trip).
    F = y.shape[-1]
    pooled = jnp.sum(y.reshape(nb, L, F) * alpha[:, :, None], axis=1)  # (nb, F)
    o_ref[...] = pooled.astype(o_ref.dtype)


def news_encode(x, conv_w, conv_b, aw, ab, aq, *, nb):
    n, L, E = x.shape
    K, _, F = conv_w.shape
    A = aw.shape[1]
    # Rows are independent, so a ragged tail block is harmless (dropped writes).
    grid = (pl.cdiv(n, nb),)
    return pl.pallas_call(
        _news_encoder_kernel,
        out_shape=jax.ShapeDtypeStruct((n, F), jnp.bfloat16),
        grid=grid,
        in_specs=[
            pl.BlockSpec((nb, L, E), lambda i: (i, 0, 0)),
            _const_spec((K, E, F), lambda i: (0, 0, 0)),
            _const_spec((1, F), lambda i: (0, 0)),
            _const_spec((F, A), lambda i: (0, 0)),
            _const_spec((1, A), lambda i: (0, 0)),
            _const_spec((1, A), lambda i: (0, 0)),
        ],
        out_specs=pl.BlockSpec((nb, F), lambda i: (i, 0)),
        compiler_params=pltpu.CompilerParams(
            dimension_semantics=("parallel",),
            vmem_limit_bytes=_vmem_limit_bytes()),
    )(x, conv_w, conv_b, aw, ab, aq)


# ----------------------------------------------------------------------------
# Kernel 2: fused user encoder pooling + candidate scoring, batched over bb
#   user  = additive-attention pool over history encodings
#   logits = torch.bmm(candidates, user.unsqueeze(-1)).squeeze(-1)
# ----------------------------------------------------------------------------
def _user_score_kernel(h_ref, c_ref, aw_ref, ab_ref, aq_ref, o_ref):
    bb, H, F = h_ref.shape
    h = h_ref[...]                                      # (bb, H, F) bf16 encodings
    # One (bb*H, F) x (F, A) MXU matmul for the whole batch slab.
    proj = jnp.tanh(jnp.dot(h.reshape(bb * H, F), aw_ref[...],
                            preferred_element_type=jnp.float32) + ab_ref[...])
    A = proj.shape[-1]
    scores = jnp.sum(proj.reshape(bb, H, A) * aq_ref[...], axis=-1)    # (bb, H)
    scores = scores - jnp.max(scores, axis=-1, keepdims=True)
    e = jnp.exp(scores)
    alpha = e * pl.reciprocal(jnp.sum(e, axis=-1, keepdims=True), approx=True)
    user = jnp.sum(h.astype(jnp.float32) * alpha[:, :, None], axis=1)  # (bb, F)
    # Candidate scoring: VPU broadcast-mul + lane reduce (no M=1 MXU matmul).
    c = c_ref[...].astype(jnp.float32)                                 # (bb, C, F)
    o_ref[...] = jnp.sum(c * user[:, None, :], axis=-1)                # (bb, C)


def user_score(hist_enc, cand_enc, aw, ab, aq, *, bb):
    B, H, F = hist_enc.shape
    _, C, _ = cand_enc.shape
    A = aw.shape[1]
    return pl.pallas_call(
        _user_score_kernel,
        out_shape=jax.ShapeDtypeStruct((B, C), jnp.float32),
        grid=(pl.cdiv(B, bb),),
        in_specs=[
            pl.BlockSpec((bb, H, F), lambda i: (i, 0, 0)),
            pl.BlockSpec((bb, C, F), lambda i: (i, 0, 0)),
            _const_spec((F, A), lambda i: (0, 0)),
            _const_spec((1, A), lambda i: (0, 0)),
            _const_spec((1, A), lambda i: (0, 0)),
        ],
        out_specs=pl.BlockSpec((bb, C), lambda i: (i, 0)),
        compiler_params=pltpu.CompilerParams(
            dimension_semantics=("parallel",),
            vmem_limit_bytes=_vmem_limit_bytes()),
    )(hist_enc, cand_enc, aw, ab, aq)


# ----------------------------------------------------------------------------
# Parameters & full NAML forward
# ----------------------------------------------------------------------------
def init_params(key, vocab, E, F, K, A):
    ks = jax.random.split(key, 6)
    s = 0.1
    bf = jnp.bfloat16
    return {
        "embedding":  jax.random.normal(ks[0], (vocab, E), jnp.float32) * s,
        # NOTE: layout is (K, E, F); PyTorch Conv1d weights (F, E, K) need transposing.
        "conv_w":     (jax.random.normal(ks[1], (K, E, F), jnp.float32) * s).astype(bf),
        "conv_b":     jnp.zeros((1, F), jnp.float32),
        "news_att_w": (jax.random.normal(ks[2], (F, A), jnp.float32) * s).astype(bf),
        "news_att_b": jnp.zeros((1, A), jnp.float32),
        "news_att_q": jax.random.normal(ks[3], (1, A), jnp.float32) * s,
        "user_att_w": (jax.random.normal(ks[4], (F, A), jnp.float32) * s).astype(bf),
        "user_att_b": jnp.zeros((1, A), jnp.float32),
        "user_att_q": jax.random.normal(ks[5], (1, A), jnp.float32) * s,
    }


def naml_forward(params, candidate_news, news_histories, user_id, target):
    # user_id is accepted for signature parity with NAML.forward but unused there.
    del user_id
    B, C, L = candidate_news.shape
    _, H, _ = news_histories.shape
    K, E, F = params["conv_w"].shape

    # Pad the attention dim to a lane-dense multiple of 128 (zero columns are
    # inert through tanh(.)·q) so the projection matmuls fill the MXU N-dim.
    aw_n = _pad_lanes(params["news_att_w"])
    ab_n = _pad_lanes(params["news_att_b"])
    aq_n = _pad_lanes(params["news_att_q"])
    aw_u = _pad_lanes(params["user_att_w"])
    ab_u = _pad_lanes(params["user_att_b"])
    aq_u = _pad_lanes(params["user_att_q"])
    # TODO(synk): for production F (e.g. 400) also pad the conv filter dim to a
    # multiple of 256 on v6e/v7x (F=128 already fills a v5e MXU pass).

    # One encoder pass over candidates AND histories (single pallas_call,
    # weights resident once, longer grid for the pipeline / megacore).
    tokens = jnp.concatenate([candidate_news.reshape(B * C, L),
                              news_histories.reshape(B * H, L)], axis=0)
    n_total = tokens.shape[0]
    # TODO(synk): at production N*L*E fuse this gather into the encoder via
    # PrefetchScalarGridSpec (token ids scalar-prefetched to SMEM); kept in XLA
    # while the (N, L, E) activation is small.
    x = params["embedding"][tokens].astype(jnp.bfloat16)        # (N, L, E)

    nb = _pick_news_block(n_total, L, E, F, aw_n.shape[-1])
    enc = news_encode(x, params["conv_w"], params["conv_b"],
                      aw_n, ab_n, aq_n, nb=nb)                   # (N, F) bf16
    cand_enc = enc[:B * C].reshape(B, C, F)
    hist_enc = enc[B * C:].reshape(B, H, F)

    # Fused user-attention pooling + torch.bmm(cand, user.unsqueeze(-1)).squeeze(-1),
    # batched over bb rows of B per grid step.
    bb = min(16, B)
    logits = user_score(hist_enc, cand_enc, aw_u, ab_u, aq_u, bb=bb)   # (B, C)

    # CrossEntropyLoss (mean reduction) — tiny scalar reduction, kept in plain JAX.
    logp = jax.nn.log_softmax(logits, axis=-1)
    loss = -jnp.mean(jnp.take_along_axis(logp, target[:, None], axis=-1))
    return logits, loss, target


if __name__ == "__main__":
    V, E, F, K, A = 100, 128, 128, 3, 64
    B, C, H, L = 2, 4, 5, 16

    key = jax.random.PRNGKey(0)
    pkey, dkey = jax.random.split(key)
    params = init_params(pkey, V, E, F, K, A)

    k1, k2, k3, k4 = jax.random.split(dkey, 4)
    candidate_news = jax.random.randint(k1, (B, C, L), 0, V, dtype=jnp.int32)
    news_histories = jax.random.randint(k2, (B, H, L), 0, V, dtype=jnp.int32)
    user_id = jax.random.randint(k3, (B,), 0, 10, dtype=jnp.int32)
    target = jax.random.randint(k4, (B,), 0, C, dtype=jnp.int32)

    fwd = jax.jit(naml_forward)
    logits, loss, labels = fwd(params, candidate_news, news_histories, user_id, target)
    jax.block_until_ready((logits, loss, labels))
    assert logits.shape == (B, C) and loss.shape == ()
    assert bool(jnp.isfinite(loss))
    print("KERNEL_OK")
</pallas_src>

<mosaic_0001>
module attributes {stable_mosaic.version = 11 : i64} {
  func.func @_news_encoder_kernel(%arg0: i32, %arg1: memref<8x16x128xbf16, #tpu.memory_space<vmem>>, %arg2: memref<3x128x128xbf16, #tpu.memory_space<vmem>>, %arg3: memref<1x128xf32, #tpu.memory_space<vmem>>, %arg4: memref<128x128xbf16, #tpu.memory_space<vmem>>, %arg5: memref<1x128xf32, #tpu.memory_space<vmem>>, %arg6: memref<1x128xf32, #tpu.memory_space<vmem>>, %arg7: memref<8x128xbf16, #tpu.memory_space<vmem>>) attributes {dimension_semantics = [#tpu.dimension_semantics<parallel>], iteration_bounds = array<i64: 3>, scalar_prefetch = 0 : i64, scratch_operands = 0 : i64, tpu.core_type = #tpu.core_type<tc>, window_params = [{transform_indices = @transform_0, window_bounds = array<i64: 8, 16, 128>}, {pipeline_mode = #tpu.pipeline_mode<synchronous>, transform_indices = @transform_1, window_bounds = array<i64: 3, 128, 128>}, {pipeline_mode = #tpu.pipeline_mode<synchronous>, transform_indices = @transform_2, window_bounds = array<i64: 1, 128>}, {pipeline_mode = #tpu.pipeline_mode<synchronous>, transform_indices = @transform_3, window_bounds = array<i64: 128, 128>}, {pipeline_mode = #tpu.pipeline_mode<synchronous>, transform_indices = @transform_4, window_bounds = array<i64: 1, 128>}, {pipeline_mode = #tpu.pipeline_mode<synchronous>, transform_indices = @transform_5, window_bounds = array<i64: 1, 128>}, {transform_indices = @transform_6, window_bounds = array<i64: 8, 128>}]} {
    %c0 = arith.constant 0 : index
    %c0_0 = arith.constant 0 : index
    %c0_1 = arith.constant 0 : index
    %0 = vector.load %arg1[%c0, %c0_0, %c0_1] : memref<8x16x128xbf16, #tpu.memory_space<vmem>>, vector<8x16x128xbf16>
    %1 = vector.shape_cast %0 : vector<8x16x128xbf16> to vector<128x128xbf16>
    %2 = tpu.iota {dimensions = array<i32: 0>} : vector<128x1xi32>
    %c16_i32 = arith.constant 16 : i32
    %c0_i32 = arith.constant 0 : i32
    %3 = arith.cmpi eq, %c16_i32, %c0_i32 : i32
    %c1_i32 = arith.constant 1 : i32
    %4 = arith.select %3, %c1_i32, %c16_i32 : i32
    %5 = vector.broadcast %4 : i32 to vector<128x1xi32>
    %6 = arith.remsi %2, %5 : vector<128x1xi32>
    %c0_i32_2 = arith.constant 0 : i32
    %7 = vector.broadcast %c0_i32_2 : i32 to vector<128x1xi32>
    %8 = arith.cmpi ne, %6, %7 : vector<128x1xi32>
    %c0_i32_3 = arith.constant 0 : i32
    %9 = vector.broadcast %c0_i32_3 : i32 to vector<128x1xi32>
    %10 = arith.cmpi slt, %6, %9 : vector<128x1xi32>
    %c0_i32_4 = arith.constant 0 : i32
    %11 = arith.cmpi slt, %4, %c0_i32_4 : i32
    %12 = vector.broadcast %11 : i1 to vector<128x1xi1>
    %13 = vector.broadcast %12 : vector<128x1xi1> to vector<128x1xi1>
    %14 = arith.xori %10, %13 : vector<128x1xi1>
    %15 = arith.andi %14, %8 : vector<128x1xi1>
    %16 = vector.broadcast %4 : i32 to vector<128x1xi32>
    %17 = arith.addi %6, %16 : vector<128x1xi32>
    %18 = arith.select %15, %17, %6 : vector<128x1xi1>, vector<128x1xi32>
    %cst = arith.constant 0.000000e+00 : bf16
    %19 = vector.broadcast %cst : bf16 to vector<1x128xbf16>
    %c0_i32_5 = arith.constant 0 : i32
    %20 = vector.broadcast %c0_i32_5 : i32 to vector<128x1xi32>
    %21 = arith.cmpi eq, %18, %20 : vector<128x1xi32>
    %22 = vector.extract_strided_slice %1 {offsets = [0, 0], sizes = [127, 128], strides = [1, 1]} : vector<128x128xbf16> to vector<127x128xbf16>
    %23 = tpu.concatenate %19, %22 in 0 : vector<1x128xbf16>, vector<127x128xbf16> -> vector<128x128xbf16>
    %cst_6 = arith.constant 0.000000e+00 : bf16
    %24 = vector.shape_cast %21 : vector<128x1xi1> to vector<128x1xi1>
    %25 = vector.broadcast %24 : vector<128x1xi1> to vector<128x128xi1>
    %26 = vector.broadcast %cst_6 : bf16 to vector<128x128xbf16>
    %27 = arith.select %25, %26, %23 : vector<128x128xi1>, vector<128x128xbf16>
    %c15_i32 = arith.constant 15 : i32
    %28 = vector.broadcast %c15_i32 : i32 to vector<128x1xi32>
    %29 = arith.cmpi eq, %18, %28 : vector<128x1xi32>
    %30 = vector.extract_strided_slice %1 {offsets = [1, 0], sizes = [127, 128], strides = [1, 1]} : vector<128x128xbf16> to vector<127x128xbf16>
    %31 = tpu.concatenate %30, %19 in 0 : vector<127x128xbf16>, vector<1x128xbf16> -> vector<128x128xbf16>
    %cst_7 = arith.constant 0.000000e+00 : bf16
    %32 = vector.shape_cast %29 : vector<128x1xi1> to vector<128x1xi1>
    %33 = vector.broadcast %32 : vector<128x1xi1> to vector<128x128xi1>
    %34 = vector.broadcast %cst_7 : bf16 to vector<128x128xbf16>
    %35 = arith.select %33, %34, %31 : vector<128x128xi1>, vector<128x128xbf16>
    %c0_8 = arith.constant 0 : index
    %c0_9 = arith.constant 0 : index
    %c0_10 = arith.constant 0 : index
    %36 = vector.load %arg2[%c0_8, %c0_9, %c0_10] : memref<3x128x128xbf16, #tpu.memory_space<vmem>>, vector<1x128x128xbf16>
    %37 = vector.shape_cast %36 : vector<1x128x128xbf16> to vector<128x128xbf16>
    %cst_11 = arith.constant dense<0.000000e+00> : vector<128x128xf32>
    %38 = tpu.matmul %27, %37, %cst_11 {dimension_numbers = #tpu.dot_dimension_numbers<[1], [0], [0], [1], [0, 0, 1, 1], [], []>} : vector<128x128xbf16>, vector<128x128xbf16>, vector<128x128xf32> -> vector<128x128xf32>
    %c1 = arith.constant 1 : index
    %c0_12 = arith.constant 0 : index
    %c0_13 = arith.constant 0 : index
    %39 = vector.load %arg2[%c1, %c0_12, %c0_13] : memref<3x128x128xbf16, #tpu.memory_space<vmem>>, vector<1x128x128xbf16>
    %40 = vector.shape_cast %39 : vector<1x128x128xbf16> to vector<128x128xbf16>
    %cst_14 = arith.constant dense<0.000000e+00> : vector<128x128xf32>
    %41 = tpu.matmul %1, %40, %cst_14 {dimension_numbers = #tpu.dot_dimension_numbers<[1], [0], [0], [1], [0, 0, 1, 1], [], []>} : vector<128x128xbf16>, vector<128x128xbf16>, vector<128x128xf32> -> vector<128x128xf32>
    %42 = arith.addf %38, %41 : vector<128x128xf32>
    %c2 = arith.constant 2 : index
    %c0_15 = arith.constant 0 : index
    %c0_16 = arith.constant 0 : index
    %43 = vector.load %arg2[%c2, %c0_15, %c0_16] : memref<3x128x128xbf16, #tpu.memory_space<vmem>>, vector<1x128x128xbf16>
    %44 = vector.shape_cast %43 : vector<1x128x128xbf16> to vector<128x128xbf16>
    %cst_17 = arith.constant dense<0.000000e+00> : vector<128x128xf32>
    %45 = tpu.matmul %35, %44, %cst_17 {dimension_numbers = #tpu.dot_dimension_numbers<[1], [0], [0], [1], [0, 0, 1, 1], [], []>} : vector<128x128xbf16>, vector<128x128xbf16>, vector<128x128xf32> -> vector<128x128xf32>
    %46 = arith.addf %42, %45 : vector<128x128xf32>
    %c0_18 = arith.constant 0 : index
    %c0_19 = arith.constant 0 : index
    %47 = vector.load %arg3[%c0_18, %c0_19] : memref<1x128xf32, #tpu.memory_space<vmem>>, vector<1x128xf32>
    %48 = vector.broadcast %47 : vector<1x128xf32> to vector<128x128xf32>
    %49 = arith.addf %46, %48 : vector<128x128xf32>
    %cst_20 = arith.constant 0.000000e+00 : f32
    %50 = vector.broadcast %cst_20 : f32 to vector<128x128xf32>
    %51 = arith.maximumf %49, %50 : vector<128x128xf32>
    %52 = arith.truncf %51 : vector<128x128xf32> to vector<128x128xbf16>
    %c0_21 = arith.constant 0 : index
    %c0_22 = arith.constant 0 : index
    %53 = vector.load %arg4[%c0_21, %c0_22] : memref<128x128xbf16, #tpu.memory_space<vmem>>, vector<128x128xbf16>
    %cst_23 = arith.constant dense<0.000000e+00> : vector<128x128xf32>
    %54 = tpu.matmul %52, %53, %cst_23 {dimension_numbers = #tpu.dot_dimension_numbers<[1], [0], [0], [1], [0, 0, 1, 1], [], []>} : vector<128x128xbf16>, vector<128x128xbf16>, vector<128x128xf32> -> vector<128x128xf32>
    %c0_24 = arith.constant 0 : index
    %c0_25 = arith.constant 0 : index
    %55 = vector.load %arg5[%c0_24, %c0_25] : memref<1x128xf32, #tpu.memory_space<vmem>>, vector<1x128xf32>
    %56 = vector.broadcast %55 : vector<1x128xf32> to vector<128x128xf32>
    %57 = arith.addf %54, %56 : vector<128x128xf32>
    %58 = math.tanh %57 : vector<128x128xf32>
    %59 = vector.shape_cast %58 : vector<128x128xf32> to vector<8x16x128xf32>
    %c0_26 = arith.constant 0 : index
    %c0_27 = arith.constant 0 : index
    %60 = vector.load %arg6[%c0_26, %c0_27] : memref<1x128xf32, #tpu.memory_space<vmem>>, vector<1x128xf32>
    %61 = vector.shape_cast %60 : vector<1x128xf32> to vector<1x1x128xf32>
    %62 = vector.broadcast %61 : vector<1x1x128xf32> to vector<8x16x128xf32>
    %63 = arith.mulf %59, %62 : vector<8x16x128xf32>
    %cst_28 = arith.constant dense<0.000000e+00> : vector<8x16xf32>
    %64 = vector.multi_reduction <add>, %63, %cst_28 [2] : vector<8x16x128xf32> to vector<8x16xf32>
    %cst_29 = arith.constant dense<0xFF800000> : vector<8xf32>
    %65 = vector.multi_reduction <maximumf>, %64, %cst_29 [1] : vector<8x16xf32> to vector<8xf32>
    %66 = vector.shape_cast %65 : vector<8xf32> to vector<8x1xf32>
    %67 = vector.broadcast %66 : vector<8x1xf32> to vector<8x16xf32>
    %68 = arith.subf %64, %67 : vector<8x16xf32>
    %69 = math.exp %68 : vector<8x16xf32>
    %cst_30 = arith.constant dense<0.000000e+00> : vector<8xf32>
    %70 = vector.multi_reduction <add>, %69, %cst_30 [1] : vector<8x16xf32> to vector<8xf32>
    %71 = vector.shape_cast %70 : vector<8xf32> to vector<8x1xf32>
    %72 = tpu.reciprocal %71 {approx = true} : vector<8x1xf32> -> vector<8x1xf32>
    %73 = vector.broadcast %72 : vector<8x1xf32> to vector<8x16xf32>
    %74 = arith.mulf %69, %73 : vector<8x16xf32>
    %75 = vector.shape_cast %51 : vector<128x128xf32> to vector<8x16x128xf32>
    %76 = vector.shape_cast %74 : vector<8x16xf32> to vector<8x16x1xf32>
    %77 = vector.broadcast %76 : vector<8x16x1xf32> to vector<8x16x128xf32>
    %78 = arith.mulf %75, %77 : vector<8x16x128xf32>
    %cst_31 = arith.constant dense<0.000000e+00> : vector<8x128xf32>
    %79 = vector.multi_reduction <add>, %78, %cst_31 [1] : vector<8x16x128xf32> to vector<8x128xf32>
    %80 = arith.truncf %79 : vector<8x128xf32> to vector<8x128xbf16>
    %c0_32 = arith.constant 0 : index
    %c0_33 = arith.constant 0 : index
    %81 = vector.load %arg7[%c0_32, %c0_33] : memref<8x128xbf16, #tpu.memory_space<vmem>>, vector<8x128xbf16>
    tpu.vector_store %arg7[%c0_32, %c0_33], %80 {strides = array<i32>} : memref<8x128xbf16, #tpu.memory_space<vmem>>, vector<8x128xbf16>,
    return
  }
  func.func @transform_0(%arg0: i32) -> (i32, i32, i32) {
    %c0_i32 = arith.constant 0 : i32
    %c0_i32_0 = arith.constant 0 : i32
    %c0_i32_1 = arith.constant 0 : i32
    return %arg0, %c0_i32, %c0_i32_0 : i32, i32, i32
  }
  func.func @transform_1(%arg0: i32) -> (i32, i32, i32) {
    %c0_i32 = arith.constant 0 : i32
    %c0_i32_0 = arith.constant 0 : i32
    %c0_i32_1 = arith.constant 0 : i32
    %c0_i32_2 = arith.constant 0 : i32
    return %c0_i32, %c0_i32_0, %c0_i32_1 : i32, i32, i32
  }
  func.func @transform_2(%arg0: i32) -> (i32, i32) {
    %c0_i32 = arith.constant 0 : i32
    %c0_i32_0 = arith.constant 0 : i32
    %c0_i32_1 = arith.constant 0 : i32
    return %c0_i32, %c0_i32_0 : i32, i32
  }
  func.func @transform_3(%arg0: i32) -> (i32, i32) {
    %c0_i32 = arith.constant 0 : i32
    %c0_i32_0 = arith.constant 0 : i32
    %c0_i32_1 = arith.constant 0 : i32
    return %c0_i32, %c0_i32_0 : i32, i32
  }
  func.func @transform_4(%arg0: i32) -> (i32, i32) {
    %c0_i32 = arith.constant 0 : i32
    %c0_i32_0 = arith.constant 0 : i32
    %c0_i32_1 = arith.constant 0 : i32
    return %c0_i32, %c0_i32_0 : i32, i32
  }
  func.func @transform_5(%arg0: i32) -> (i32, i32) {
    %c0_i32 = arith.constant 0 : i32
    %c0_i32_0 = arith.constant 0 : i32
    %c0_i32_1 = arith.constant 0 : i32
    return %c0_i32, %c0_i32_0 : i32, i32
  }
  func.func @transform_6(%arg0: i32) -> (i32, i32) {
    %c0_i32 = arith.constant 0 : i32
    %c0_i32_0 = arith.constant 0 : i32
    return %arg0, %c0_i32 : i32, i32
  }
}

module attributes {stable_mosaic.version = 11 : i64} {
  func.func @_user_score_kernel(%arg0: i32, %arg1: memref<2x5x128xbf16, #tpu.memory_space<vmem>>, %arg2: memref<2x4x128xbf16, #tpu.memory_space<vmem>>, %arg3: memref<128x128xbf16, #tpu.memory_space<vmem>>, %arg4: memref<1x128xf32, #tpu.memory_space<vmem>>, %arg5: memref<1x128xf32, #tpu.memory_space<vmem>>, %arg6: memref<2x4xf32, #tpu.memory_space<vmem>>) attributes {dimension_semantics = [#tpu.dimension_semantics<parallel>], iteration_bounds = array<i64: 1>, scalar_prefetch = 0 : i64, scratch_operands = 0 : i64, tpu.core_type = #tpu.core_type<tc>, window_params = [{transform_indices = @transform_0, window_bounds = array<i64: 2, 5, 128>}, {transform_indices = @transform_1, window_bounds = array<i64: 2, 4, 128>}, {pipeline_mode = #tpu.pipeline_mode<synchronous>, transform_indices = @transform_2, window_bounds = array<i64: 128, 128>}, {pipeline_mode = #tpu.pipeline_mode<synchronous>, transform_indices = @transform_3, window_bounds = array<i64: 1, 128>}, {pipeline_mode = #tpu.pipeline_mode<synchronous>, transform_indices = @transform_4, window_bounds = array<i64: 1, 128>}, {transform_indices = @transform_5, window_bounds = array<i64: 2, 4>}]} {
    %c0 = arith.constant 0 : index
    %c0_0 = arith.constant 0 : index
    %c0_1 = arith.constant 0 : index
    %0 = vector.load %arg1[%c0, %c0_0, %c0_1] : memref<2x5x128xbf16, #tpu.memory_space<vmem>>, vector<2x5x128xbf16>
    %1 = vector.shape_cast %0 : vector<2x5x128xbf16> to vector<10x128xbf16>
    %c0_2 = arith.constant 0 : index
    %c0_3 = arith.constant 0 : index
    %2 = vector.load %arg3[%c0_2, %c0_3] : memref<128x128xbf16, #tpu.memory_space<vmem>>, vector<128x128xbf16>
    %cst = arith.constant dense<0.000000e+00> : vector<10x128xf32>
    %3 = tpu.matmul %1, %2, %cst {dimension_numbers = #tpu.dot_dimension_numbers<[1], [0], [0], [1], [0, 0, 1, 1], [], []>} : vector<10x128xbf16>, vector<128x128xbf16>, vector<10x128xf32> -> vector<10x128xf32>
    %c0_4 = arith.constant 0 : index
    %c0_5 = arith.constant 0 : index
    %4 = vector.load %arg4[%c0_4, %c0_5] : memref<1x128xf32, #tpu.memory_space<vmem>>, vector<1x128xf32>
    %5 = vector.broadcast %4 : vector<1x128xf32> to vector<10x128xf32>
    %6 = arith.addf %3, %5 : vector<10x128xf32>
    %7 = math.tanh %6 : vector<10x128xf32>
    %8 = vector.shape_cast %7 : vector<10x128xf32> to vector<2x5x128xf32>
    %c0_6 = arith.constant 0 : index
    %c0_7 = arith.constant 0 : index
    %9 = vector.load %arg5[%c0_6, %c0_7] : memref<1x128xf32, #tpu.memory_space<vmem>>, vector<1x128xf32>
    %10 = vector.shape_cast %9 : vector<1x128xf32> to vector<1x1x128xf32>
    %11 = vector.broadcast %10 : vector<1x1x128xf32> to vector<2x5x128xf32>
    %12 = arith.mulf %8, %11 : vector<2x5x128xf32>
    %cst_8 = arith.constant dense<0.000000e+00> : vector<2x5xf32>
    %13 = vector.multi_reduction <add>, %12, %cst_8 [2] : vector<2x5x128xf32> to vector<2x5xf32>
    %cst_9 = arith.constant dense<0xFF800000> : vector<2xf32>
    %14 = vector.multi_reduction <maximumf>, %13, %cst_9 [1] : vector<2x5xf32> to vector<2xf32>
    %15 = vector.shape_cast %14 : vector<2xf32> to vector<2x1xf32>
    %16 = vector.broadcast %15 : vector<2x1xf32> to vector<2x5xf32>
    %17 = arith.subf %13, %16 : vector<2x5xf32>
    %18 = math.exp %17 : vector<2x5xf32>
    %cst_10 = arith.constant dense<0.000000e+00> : vector<2xf32>
    %19 = vector.multi_reduction <add>, %18, %cst_10 [1] : vector<2x5xf32> to vector<2xf32>
    %20 = vector.shape_cast %19 : vector<2xf32> to vector<2x1xf32>
    %21 = tpu.reciprocal %20 {approx = true} : vector<2x1xf32> -> vector<2x1xf32>
    %22 = vector.broadcast %21 : vector<2x1xf32> to vector<2x5xf32>
    %23 = arith.mulf %18, %22 : vector<2x5xf32>
    %24 = arith.extf %0 : vector<2x5x128xbf16> to vector<2x5x128xf32>
    %25 = vector.shape_cast %23 : vector<2x5xf32> to vector<2x5x1xf32>
    %26 = vector.broadcast %25 : vector<2x5x1xf32> to vector<2x5x128xf32>
    %27 = arith.mulf %24, %26 : vector<2x5x128xf32>
    %cst_11 = arith.constant dense<0.000000e+00> : vector<2x128xf32>
    %28 = vector.multi_reduction <add>, %27, %cst_11 [1] : vector<2x5x128xf32> to vector<2x128xf32>
    %c0_12 = arith.constant 0 : index
    %c0_13 = arith.constant 0 : index
    %c0_14 = arith.constant 0 : index
    %29 = vector.load %arg2[%c0_12, %c0_13, %c0_14] : memref<2x4x128xbf16, #tpu.memory_space<vmem>>, vector<2x4x128xbf16>
    %30 = arith.extf %29 : vector<2x4x128xbf16> to vector<2x4x128xf32>
    %31 = vector.shape_cast %28 : vector<2x128xf32> to vector<2x1x128xf32>
    %32 = vector.broadcast %31 : vector<2x1x128xf32> to vector<2x4x128xf32>
    %33 = arith.mulf %30, %32 : vector<2x4x128xf32>
    %cst_15 = arith.constant dense<0.000000e+00> : vector<2x4xf32>
    %34 = vector.multi_reduction <add>, %33, %cst_15 [2] : vector<2x4x128xf32> to vector<2x4xf32>
    %c0_16 = arith.constant 0 : index
    %c0_17 = arith.constant 0 : index
    %35 = vector.load %arg6[%c0_16, %c0_17] : memref<2x4xf32, #tpu.memory_space<vmem>>, vector<2x4xf32>
    tpu.vector_store %arg6[%c0_16, %c0_17], %34 {strides = array<i32>} : memref<2x4xf32, #tpu.memory_space<vmem>>, vector<2x4xf32>,
    return
  }
  func.func @transform_0(%arg0: i32) -> (i32, i32, i32) {
    %c0_i32 = arith.constant 0 : i32
    %c0_i32_0 = arith.constant 0 : i32
    %c0_i32_1 = arith.constant 0 : i32
    return %arg0, %c0_i32, %c0_i32_0 : i32, i32, i32
  }
  func.func @transform_1(%arg0: i32) -> (i32, i32, i32) {
    %c0_i32 = arith.constant 0 : i32
    %c0_i32_0 = arith.constant 0 : i32
    %c0_i32_1 = arith.constant 0 : i32
    return %arg0, %c0_i32, %c0_i32_0 : i32, i32, i32
  }
  func.func @transform_2(%arg0: i32) -> (i32, i32) {
    %c0_i32 = arith.constant 0 : i32
    %c0_i32_0 = arith.constant 0 : i32
    %c0_i32_1 = arith.constant 0 : i32
    return %c0_i32, %c0_i32_0 : i32, i32
  }
  func.func @transform_3(%arg0: i32) -> (i32, i32) {
    %c0_i32 = arith.constant 0 : i32
    %c0_i32_0 = arith.constant 0 : i32
    %c0_i32_1 = arith.constant 0 : i32
    return %c0_i32, %c0_i32_0 : i32, i32
  }
  func.func @transform_4(%arg0: i32) -> (i32, i32) {
    %c0_i32 = arith.constant 0 : i32
    %c0_i32_0 = arith.constant 0 : i32
    %c0_i32_1 = arith.constant 0 : i32
    return %c0_i32, %c0_i32_0 : i32, i32
  }
  func.func @transform_5(%arg0: i32) -> (i32, i32) {
    %c0_i32 = arith.constant 0 : i32
    %c0_i32_0 = arith.constant 0 : i32
    return %arg0, %c0_i32 : i32, i32
  }
}

</mosaic_0001>

<bundles_post_ra>
// kernel: naml_forward.3
= control target key start
LH: loop header
LB: loop body
LE: loop exit
PB: predicated region body
PF: predicated region fallthrough
CT: control target
= control target key end

     0   :  { %v28_v0 = vlaneseq  ;;  %v676_v1 = vmov 0.0   ;;  %vm677_vm0 = vmmov 0   ;;  %v678_v3 = vmov 1966171168   ;;  %s825_s2 = inlined_call_operand.vmem [shape: bf16[128,128], index: 2, kind: input, shape index: {}]   ;;  %s826_s0 = inlined_call_operand.vmem [shape: bf16[2,5,128], index: 0, kind: input, shape index: {}]   ;;  %s827_s3 = inlined_call_operand.vmem [shape: f32[1,128], index: 3, kind: input, shape index: {}]   ;;  %s828_s4 = inlined_call_operand.vmem [shape: f32[1,128], index: 4, kind: input, shape index: {}]   ;;  %s829_s1 = inlined_call_operand.vmem [shape: bf16[2,4,128], index: 1, kind: input, shape index: {}]   ;;  %s830_s5 = inlined_call_operand.vmem [shape: f32[2,4], index: 5, kind: output, shape index: {}]  }
   0x1   :  { %632 = vmatprep.subr.bf16.mxu0 %v676_v1  ;;  %v658_v2 = vld [vmem:[%s825_s2] sm:$0xff]   ;;  %648 = vmatprep.mubr.msk.bf16.mxu0 %vm677_vm0, %v676_v1  ;;  %v26_v4 = vunpack.c.l.s4 %v678_v3  ;;  %v659_v6 = vld [vmem:[%s825_s2 + $0x8] sm:$0xff]   ;;  %v660_v9 = vld [vmem:[%s825_s2 + $0x10] sm:$0xff]   ;;  %vm473_vm1 = vcmask 1044480   ;;  %vm492_vm2 = vcmask 1041409   ;;  %vm495_vm3 = vcmask 33792  }
   0x2   :  { %v714_v5 = vshrl.u32 %v28_v0, 7  ;;  %633 = vmatpush3.bf16.msra.mxu0 %v658_v2  ;;  %v728_v10 = vld [vmem:[%s826_s0] sm:$0x7]  ;;  %v733_v11 = vld [vmem:[%s826_s0 + $0x4] sm:$0x7]  ;;  %v661_v14 = vld [vmem:[%s825_s2 + $0x18] sm:$0xff]  }
   0x3   :  { %v27_v7 = vunpack.c.0.s8 %v26_v4  ;;  %634 = vmatprep.subr.bf16.mxu0 %v676_v1  ;;  %v662_v23 = vld [vmem:[%s825_s2 + $0x20] sm:$0xff]   ;;  %v663_v30 = vld [vmem:[%s825_s2 + $0x28] sm:$0xff]   ;;  %v664_v35 = vld [vmem:[%s825_s2 + $0x30] sm:$0xff]   ;;  %vm585_vm4 = vcmask 1043456   ;;  %vm604_vm5 = vcmask 25600  }
   0x4   :  { %v665_v39 = vld [vmem:[%s825_s2 + $0x38] sm:$0xff]   ;;  %v610_v41 = vld [vmem:[%s827_s3] ss:$0 sm:$0xff] }
   0x5   :  { %v720_v8 = vsub.s32 %v27_v7, %v714_v5  ;;  %v622_v48 = vld [vmem:[%s828_s4] ss:$0 sm:$0xff] }
   0x6   :  { %635 = vmatpush3.bf16.msra.mxu0 %v659_v6  ;;  %v329_v50 = vcombine.high %v622_v48, %v622_v48 }
   0x7   :  { %636 = vmatprep.subr.bf16.mxu0 %v676_v1  ;;  %v31_v12 = vrot.slane %v728_v10, %v720_v8  ;;  %v54_v13 = vrot.slane %v733_v11, %v720_v8  ;;  %v336_v49 = vrot.slane %v622_v48, %v720_v8  ;;  %v483_v48 = vand.u32 127, %v28_v0 }
   0x8   :  { %v343_v53 = vrot.slane %v329_v50, %v720_v8  ;;  %v502_v0 = vsub.s32 0, %v714_v5 }
   0x9   :  { %v32_v15 = vcombine.high %v31_v12, %v31_v12  ;;  %v39_v16 = vrot.slane %v31_v12, %v720_v8  ;;  %v55_v17 = vcombine.high %v54_v13, %v54_v13  ;;  %v62_v18 = vrot.slane %v54_v13, %v720_v8 }
   0xa   :  { %637 = vmatpush3.bf16.msra.mxu0 %v660_v9  ;;  %v344_v51 = vcombine.high %v336_v49, %v336_v49  ;;  %v351_v56 = vrot.slane %v336_v49, %v720_v8  ;;  %v358_v63 = vrot.slane %v343_v53, %v720_v8  ;;  %v797_v50 = vsub.s32 %v483_v48, %v714_v5 }
   0xb   :  { %638 = vmatprep.subr.bf16.mxu0 %v676_v1  ;;  %v46_v19 = vrot.slane %v32_v15, %v720_v8  ;;  %v47_v20 = vcombine.high %v39_v16, %v39_v16  ;;  %v69_v21 = vrot.slane %v55_v17, %v720_v8  ;;  %v70_v22 = vcombine.high %v62_v18, %v62_v18 }
   0xc   :  { %v77_v24 = vunpack.i.h.s16 %v62_v18  ;;  %v365_v58 = vrot.slane %v344_v51, %v720_v8  ;;  %v366_v4 = vcombine.high %v351_v56, %v351_v56 }
   0xd   :  { %v79_v25 = vunpack.i.h.s16 %v69_v21  ;;  %v611_v26 = vpack.i.b16 %v62_v18, %v47_v20  ;;  %v109_v27 = vcombine.low %v39_v16, %v46_v19 }
   0xe   :  { %639 = vmatpush3.bf16.msra.mxu0 %v661_v14  ;;  %v612_v28 = vpack.i.b16 %v69_v21, %v77_v24  ;;  %v367_v12 = vcombine.high %v365_v58, %v365_v58 }
   0xf   :  { %640 = vmatprep.subr.bf16.mxu0 %v676_v1  ;;  %v613_v29 = vpack.i.b16 %v70_v22, %v79_v25  ;;  %v117_v32 = vrot.slane %v109_v27, %v720_v8 }
  0x10   :  { %v110_v31 = vcombine.low %v611_v26, %v612_v28 }
  0x11   :  { %v131_v34 = vrot.slane %v613_v29, %v720_v8 }
  0x12   :  { %641 = vmatpush3.bf16.msra.mxu0 %v662_v23  ;;  %v124_v33 = vrot.slane %v110_v31, %v720_v8 }
  0x13   :  { %642 = vmatprep.subr.bf16.mxu0 %v676_v1  ;;  %v146_v38 = vrot.slane %v131_v34, %v720_v8 }
  0x14   :  { %v132_v36 = vcombine.low %v117_v32, %v124_v33 }
  0x16   :  { %643 = vmatpush3.bf16.msra.mxu0 %v663_v30  ;;  %v139_v37 = vrot.slane %v132_v36, %v720_v8 }
  0x17   :  { %644 = vmatprep.subr.bf16.mxu0 %v676_v1 }
  0x18   :  { %v147_v40 = vcombine.low %v139_v37, %v146_v38 }
  0x1a   :  { %645 = vmatpush3.bf16.msra.mxu0 %v664_v35 }
  0x1b   :  { %646 = vmatprep.subr.bf16.mxu0 %v676_v1 }
  0x1e   :  { %647 = vmatpush3.bf16.msra.mxu0 %v665_v39 }
  0x21   :  { %649 = vmatmul.mubr.bf16.vlgmr.msra.gmra.mrb[0].mxu0 %v147_v40 }
  0xf4   :  { %v231_v42 = vpop.f32.mrb[0].mxu0 }
  0xf5   :  { %v232_v43 = vadd.f32 %v610_v41, %v231_v42  ;;  %v650_v44 = vpop.f32.mrb[1].mxu0 }
  0xf6   :  { %v234_v45 = vpop.f32.mrb[2].mxu0 }
  0xf7   :  { %666 = vtanh.f32 %v232_v43  ;;  %v235_v46 = vadd.f32 %v610_v41, %v234_v45  ;;  %v651_v47 = vpop.f32.mrb[3].mxu0 }
  0xf9   :  { %668 = vtanh.f32 %v235_v46 }
 0x101   :  { %v667_v52 = vpop.eup %666 }
 0x102   :  { %v242_v54 = vcombine.high %v667_v52, %v667_v52  ;;  %v249_v55 = vrot.slane %v667_v52, %v720_v8 }
 0x103   :  { %v669_v57 = vpop.eup %668 }
 0x104   :  { %v257_v59 = vcombine.high %v249_v55, %v249_v55  ;;  %v297_v60 = vrot.slane %v669_v57, %v720_v8  ;;  %v256_v61 = vrot.slane %v242_v54, %v720_v8  ;;  %v265_v62 = vrot.slane %v249_v55, %v720_v8 }
 0x105   :  { %v679_v55 = vmov 0  }
 0x106   :  { %v272_v1 = vrot.slane %v256_v61, %v720_v8  ;;  %v279_v2 = vrot.slane %v257_v59, %v720_v8  ;;  %v287_v3 = vcombine.high %v265_v62, %v265_v62  ;;  %v258_v6 = vcombine.high %v256_v61, %v256_v61  ;;  %657 = vset.pattern.permute.xlu0 %v679_v55 }
 0x107   :  { %v298_v7 = vcombine.high %v297_v60, %v297_v60  ;;  %v373_v13 = vmul.f32 %v351_v56, %v265_v62  ;;  %v305_v15 = vrot.slane %v297_v60, %v720_v8  ;;  %656 = vset.pattern.permute.xlu1 %v679_v55 }
 0x108   :  { %v289_v9 = vcombine.high %v279_v2, %v279_v2  ;;  %v374_v14 = vmul.f32 %v365_v58, %v279_v2  ;;  %v288_v16 = vcombine.high %v272_v1, %v272_v1  ;;  %v286_v17 = vrot.slane %v258_v6, %v720_v8 }
 0x109   :  { %v312_v18 = vrot.slane %v298_v7, %v720_v8  ;;  %v375_v19 = vmul.f32 %v366_v4, %v287_v3  ;;  %v377_v21 = vmul.f32 %v358_v63, %v272_v1  ;;  %v381_v28 = vmul.f32 %v367_v12, %v305_v15 }
 0x10a   :  { %v376_v20 = vmul.f32 %v367_v12, %v289_v9  ;;  %v393_v22 = vcombine.low %v373_v13, %v374_v14  ;;  %v290_v23 = vcombine.high %v286_v17, %v286_v17  ;;  %v378_v24 = vmul.f32 %v351_v56, %v286_v17 }
 0x10b   :  { %v379_v25 = vmul.f32 %v365_v58, %v288_v16  ;;  %v382_v29 = vmul.f32 %v358_v63, %v312_v18  ;;  %v415_v33 = vrot.slane %v377_v21, %v720_v8  ;;  %v506_v56 = vsub.s32 1, %v714_v5 }
 0x10c   :  { %v394_v26 = vcombine.low %v375_v19, %v376_v20  ;;  %v380_v27 = vmul.f32 %v366_v4, %v290_v23  ;;  %v401_v31 = vrot.slane %v393_v22, %v720_v8  ;;  %v551_v18 = vunpack.c.l.bf16 %v728_v10 }
 0x10d   :  { %v432_v30 = vcombine.low %v378_v24, %v379_v25  ;;  %v454_v38 = vrot.slane %v382_v29, %v720_v8  ;;  %v430_v40 = vrot.slane %v415_v33, %v720_v8  ;;  %v552_v21 = vunpack.c.l.bf16 %v733_v11  ;;  %v580_v11 = vld [vmem:[%s829_s1 + $0x2] sm:$0x3] }
 0x10e   :  { %v408_v32 = vrot.slane %v394_v26, %v720_v8  ;;  %v433_v34 = vcombine.low %v380_v27, %v381_v28 }
 0x10f   :  { %v440_v36 = vrot.slane %v432_v30, %v720_v8  ;;  %v469_v44 = vrot.slane %v454_v38, %v720_v8  ;;  %v579_v30 = vld [vmem:[%s829_s1] sm:$0x3] }
 0x110   :  { %v416_v35 = vcombine.low %v401_v31, %v408_v32  ;;  %v447_v37 = vrot.slane %v433_v34, %v720_v8  ;;  %v581_v34 = vunpack.c.l.bf16 %v579_v30 }
 0x112   :  { %v423_v39 = vrot.slane %v416_v35, %v720_v8  ;;  %v455_v41 = vcombine.low %v440_v36, %v447_v37 }
 0x114   :  { %v431_v42 = vcombine.low %v423_v39, %v430_v40  ;;  %v462_v43 = vrot.slane %v455_v41, %v720_v8  ;;  %v582_v39 = vunpack.c.l.bf16 %v580_v11 }
 0x116   :  { %v474_v45 = vsel %vm473_vm1, %v431_v42, 0.0  ;;  %v470_v46 = vcombine.low %v462_v43, %v469_v44 }
 0x117   :  { %475 = vadd.xlane.f32.xlu0 %v474_v45 }
 0x118   :  { %v477_v47 = vsel %vm473_vm1, %v470_v46, 0.0 }
 0x11b   :  { %478 = vadd.xlane.f32.xlu0 %v477_v47 }
 0x1a4   :  { %v476_v49 = vpop.xlane.xlu0 %475 }
 0x1a5   :  { %v487_v52 = vrot.slane %v476_v49, %v797_v50 }
 0x1a8   :  { %v479_v51 = vpop.xlane.xlu0 %478 }
 0x1a9   :  { %v491_v53 = vrot.slane %v479_v51, %v797_v50 }
 0x1ab   :  { %v493_v8 = vsel %vm492_vm2, %v491_v53, %v487_v52 }
 0x1ac   :  { %v496_v54 = vsel %vm495_vm3, %v493_v8, -inf }
 0x1ad   :  { %497 = vmax.xlane.f32.xlu1 %v496_v54 }
 0x23a   :  { %v498_v57 = vpop.xlane.xlu1 %497 }
 0x23b   :  { %v503_v58 = vrot.slane %v498_v57, %v502_v0  ;;  %v507_v59 = vrot.slane %v498_v57, %v506_v56 }
 0x23d   :  { %v510_v60 = vsub.f32 %v476_v49, %v503_v58  ;;  %v511_v61 = vsub.f32 %v479_v51, %v507_v59 }
 0x23f   :  { %v512_v62 = vmul.f32 1.442695, %v510_v60  ;;  %v514_v63 = vmul.f32 1.442695, %v511_v61 }
 0x241   :  { %670 = vpow2.f32 %v512_v62 }
 0x242   :  { %672 = vpow2.f32 %v514_v63 }
 0x24b   :  { %v671_v1 = vpop.eup %670 }
 0x24c   :  { %v673_v2 = vpop.eup %672  ;;  %519 = vperm.xlu1 %656, %v671_v1  }
 0x24d   :  { %522 = vperm.xlu0 %657, %v673_v2  }
 0x2cb   :  { %v520_v3 = vpop.permute.xlu1 %519 }
 0x2cc   :  { %v523_v4 = vpop.permute.xlu0 %522  ;;  %v527_v6 = vrot.slane %v520_v3, %v797_v50 }
 0x2cd   :  { %v531_v7 = vrot.slane %v523_v4, %v797_v50 }
 0x2cf   :  { %v532_v5 = vsel %vm492_vm2, %v531_v7, %v527_v6 }
 0x2d0   :  { %v534_v9 = vsel %vm495_vm3, %v532_v5, 0.0 }
 0x2d1   :  { %535 = vadd.xlane.f32.xlu1 %v534_v9 }
 0x35e   :  { %v536_v12 = vpop.xlane.xlu1 %535 }
 0x35f   :  { %674 = vrcp.f32 %v536_v12 }
 0x369   :  { %v675_v13 = vpop.eup %674 }
 0x36a   :  { %v542_v14 = vrot.slane %v675_v13, %v502_v0  ;;  %v546_v16 = vrot.slane %v675_v13, %v506_v56 }
 0x36c   :  { %v549_v15 = vmul.f32 %v671_v1, %v542_v14  ;;  %v550_v17 = vmul.f32 %v673_v2, %v546_v16 }
 0x36e   :  { %555 = vperm.xlu0 %657, %v549_v15  }
 0x372   :  { %560 = vperm.xlu0 %657, %v550_v17  }
 0x3ed   :  { %v556_v19 = vpop.permute.xlu0 %555 }
 0x3ee   :  { %v563_v20 = vmul.f32 %v556_v19, %v551_v18 }
 0x3f0   :  { %v565_v22 = vsel %vm473_vm1, %v563_v20, 0.0 }
 0x3f1   :  { %v566_v23 = vrot.slane %v565_v22, 4  ;;  %v561_v24 = vpop.permute.xlu0 %560 }
 0x3f2   :  { %v564_v25 = vmul.f32 %v561_v24, %v552_v21 }
 0x3f3   :  { %v567_v26 = vadd.f32 %v566_v23, %v565_v22 }
 0x3f4   :  { %v572_v27 = vsel %vm473_vm1, %v564_v25, 0.0 }
 0x3f5   :  { %v568_v28 = vrot.slane %v567_v26, 2  ;;  %v573_v29 = vrot.slane %v572_v27, 4 }
 0x3f7   :  { %v569_v31 = vadd.f32 %v568_v28, %v567_v26  ;;  %v574_v10 = vadd.f32 %v573_v29, %v572_v27 }
 0x3f9   :  { %v575_v32 = vrot.slane %v574_v10, 2  ;;  %v570_v33 = vrot.slane %v569_v31, 1 }
 0x3fb   :  { %v576_v35 = vadd.f32 %v575_v32, %v574_v10  ;;  %v571_v36 = vadd.f32 %v570_v33, %v569_v31 }
 0x3fd   :  { %v583_v37 = vmul.f32 %v581_v34, %v571_v36  ;;  %v577_v38 = vrot.slane %v576_v35, 1 }
 0x3ff   :  { %v586_v40 = vsel %vm585_vm4, %v583_v37, 0.0  ;;  %v578_v41 = vadd.f32 %v577_v38, %v576_v35 }
 0x400   :  { %587 = vadd.xlane.f32.xlu1 %v586_v40 }
 0x401   :  { %v584_v42 = vmul.f32 %v582_v39, %v578_v41 }
 0x403   :  { %v589_v43 = vsel %vm585_vm4, %v584_v42, 0.0 }
 0x404   :  { %590 = vadd.xlane.f32.xlu0 %v589_v43 }
 0x48d   :  { %v588_v44 = vpop.xlane.xlu1 %587 }
 0x48e   :  { %v597_v46 = vrot.slane %v588_v44, %v797_v50 }
 0x491   :  { %v591_v45 = vpop.xlane.xlu0 %590 }
 0x492   :  { %v601_v47 = vrot.slane %v591_v45, %v797_v50 }
 0x494   :  { %v602_v48 = vsel %vm492_vm2, %v601_v47, %v597_v46 }
 0x495   :  { %605 = vst.msk [vmem:[%s830_s5] sm:$0x3] %vm604_vm5, %v602_v48 }

// kernel: naml_forward.2
= control target key start
LH: loop header
LB: loop body
LE: loop exit
PB: predicated region body
PF: predicated region fallthrough
CT: control target
= control target key end

     0   :  { %s2907_s21 = smov 0   ;;  %s3801_s0 = inlined_call_operand.vmem [shape: bf16[18,16,128], index: 0, kind: input, shape index: {}]   ;;  %s3802_s1 = inlined_call_operand.vmem [shape: bf16[3,128,128], index: 1, kind: input, shape index: {}]   ;;  %s3803_s2 = inlined_call_operand.vmem [shape: f32[1,128], index: 2, kind: input, shape index: {}]   ;;  %s3804_s3 = inlined_call_operand.vmem [shape: bf16[128,128], index: 3, kind: input, shape index: {}]   ;;  %s3805_s4 = inlined_call_operand.vmem [shape: f32[1,128], index: 4, kind: input, shape index: {}]   ;;  %s3806_s5 = inlined_call_operand.vmem [shape: f32[1,128], index: 5, kind: input, shape index: {}]   ;;  %s3807_s6 = inlined_call_operand.vmem [shape: bf16[18,128], index: 6, kind: output, shape index: {}]  }
   0x1 LB: > { %s2913_s22 = sadd.s32 4294967295, %s2868_s21   ;;  %p2357_p0 = scmp.ge.s32.totalorder %s2868_s21, 1  ;;  %s2868_s21 = sphi %s2907_s21, %s16_s21  }
   0x2   : > { %p224_p1 = scmp.lt.s32.totalorder %s2868_s21, 4 }
   0x4   : > { %p225_p2 = pnand %p2357_p0, %p224_p1 }
   0x5   : > { %v2756_v0 = vld [vmem:[%s3802_s1] sm:$0xff] (!%p225_p2)   ;;  %s2358_s25 = sshll.u32 (!%p225_p2), %s2913_s22, 3  ;;  %v299_v1 = vlaneseq (!%p225_p2)  ;;  %v2757_v2 = vld [vmem:[%s3802_s1 + $0x8] sm:$0xff] (!%p225_p2)   ;;  %v2758_v4 = vld [vmem:[%s3802_s1 + $0x10] sm:$0xff] (!%p225_p2)   ;;  %vm636_vm1 = vcmask (!%p225_p2), 1040384   ;;  %v2870_v10 = vmov (!%p225_p2), 0  }
   0x6   : > { %228 = sbr.rel (%p225_p2) target bundleno = 1396 (0x574), region = 44  ;;  %p265_p3 = scmp.lt.s32.totalorder (!%p225_p2), %s2358_s25, 17  ;;  %2616 = vmatprep.subr.bf16.mxu0 (!%p225_p2), %v2756_v0  ;;  %v2759_v6 = vld [vmem:[%s3802_s1 + $0x18] sm:$0xff] (!%p225_p2)   ;;  %v2764_v8 = vld [vmem:[%s3802_s1 + $0x40] sm:$0xff] (!%p225_p2)   ;;  %vm564_vm2 = vsmask.f32 (!%p225_p2), 256  ;;  %2755 = vset.pattern.permute.xlu0 (!%p225_p2), %v2870_v10 }
   0x7   : > { %v2925_v3 = vshrl.u32 (!%p225_p2), %v299_v1, 7  ;;  %2617 = vmatpush3.bf16.msra.mxu0 (!%p225_p2), %v2756_v0  ;;  %2584 = vmatprep.subr.bf16.mxu1 (!%p225_p2), %v2764_v8  ;;  %v2760_v11 = vld [vmem:[%s3802_s1 + $0x20] sm:$0xff] (!%p225_p2)   ;;  %vm2871_vm4 = vmmov (!%p225_p2), 0   ;;  %vm2974_vm6 = vmand (!%p225_p2), %vm636_vm1, %vm564_vm2  ;;  %v2768_v22 = vld [vmem:[%s3802_s1 + $0x48] sm:$0xff] (!%p225_p2)   ;;  %p276_p4 = scmp.lt.s32.totalorder (!%p225_p2), %s2913_s22, 2 }
   0x8   : > { %2618 = vmatprep.subr.bf16.mxu0 (!%p225_p2), %v2757_v2  ;;  %2585 = vmatpush3.bf16.msra.mxu1 (!%p225_p2), %v2764_v8  ;;  %vm672_vm5 = vmpackc.low (!%p225_p2), %vm2871_vm4, %vm2871_vm4  ;;  %v2770_v27 = vld [vmem:[%s3802_s1 + $0x50] sm:$0xff] (!%p225_p2)   ;;  %v2761_v28 = vld [vmem:[%s3802_s1 + $0x28] sm:$0xff] (!%p225_p2)  }
   0x9   : > { %v320_v5 = vand.u32 (!%p225_p2), 15, %v2925_v3  ;;  %v302_v15 = vadd.s32 (!%p225_p2), 16, %v2925_v3  ;;  %v2966_v17 = vsel (!%p225_p2), %vm672_vm5, 65537, %v2870_v10  ;;  %2754 = vset.pattern.permute.xlu1 (!%p225_p2), %v2870_v10  ;;  %v304_v23 = vadd.s32 (!%p225_p2), 32, %v2925_v3  ;;  %2586 = vmatprep.subr.bf16.mxu1 (!%p225_p2), %v2768_v22  ;;  %v2762_v34 = vld [vmem:[%s3802_s1 + $0x30] sm:$0xff] (!%p225_p2)   ;;  %v2763_v38 = vld [vmem:[%s3802_s1 + $0x38] sm:$0xff] (!%p225_p2)  }
   0xa   : > { %v306_v24 = vadd.s32 (!%p225_p2), 48, %v2925_v3  ;;  %v2774_v41 = vld [vmem:[%s3802_s1 + $0x58] sm:$0xff] (!%p225_p2)   ;;  %v308_v42 = vadd.s32 (!%p225_p2), 64, %v2925_v3  ;;  %v2776_v48 = vld [vmem:[%s3802_s1 + $0x60] sm:$0xff] (!%p225_p2)   ;;  %v310_v57 = vadd.s32 (!%p225_p2), 80, %v2925_v3  ;;  %v2780_v0 = vld [vmem:[%s3802_s1 + $0x68] sm:$0xff] (!%p225_p2)  }
   0xb   : > { %2619 = vmatpush3.bf16.msra.mxu0 (!%p225_p2), %v2757_v2  ;;  %vm2939_vm0 = vcmp.eq.s32.totalorder (!%p225_p2), %v320_v5, 0  ;;  %v334_v18 = vand.u32 (!%p225_p2), 15, %v302_v15  ;;  %v348_v31 = vand.u32 (!%p225_p2), 15, %v304_v23  ;;  %v2767_v55 = vld [vmem:[%s3802_s1 + $0x80] sm:$0xff] (!%p225_p2)   ;;  %v2769_v2 = vld [vmem:[%s3802_s1 + $0x88] sm:$0xff] (!%p225_p2)   ;;  %v303_v58 = vadd.s32 (!%p225_p2), 24, %v2925_v3 }
   0xc   : > { %2620 = vmatprep.subr.bf16.mxu0 (!%p225_p2), %v2758_v4  ;;  %vm671_vm3 = vmpackc.low (!%p225_p2), %vm2939_vm0, %vm2939_vm0  ;;  %2587 = vmatpush3.bf16.msra.mxu1 (!%p225_p2), %v2768_v22  ;;  %v362_v33 = vand.u32 (!%p225_p2), 15, %v306_v24  ;;  %v376_v49 = vand.u32 (!%p225_p2), 15, %v308_v42  ;;  %v390_v63 = vand.u32 (!%p225_p2), 15, %v310_v57  ;;  %v2792_v57 = vld [vmem:[%s3804_s3 + $0x20] sm:$0xff] (!%p225_p2)  }
   0xd   : > { %s3885_s25 = smov (!%p265_p3, %s2358_s25), 17  ;;  %v687_v14 = vsel %vm671_vm3, 65537, %v2870_v10  ;;  %vm2987_vm7 = vcmp.eq.s32.totalorder %v334_v18, 0  ;;  %2588 = vmatprep.subr.bf16.mxu1 %v2770_v27  ;;  %vm512_vm10 = vcmp.eq.s32.totalorder %v348_v31, 0  ;;  %s3887_s22 = smov (!%p276_p4, %s2913_s22), 2 }
   0xe   : > { %s2495_s30 = sshll.u32 %s3885_s25, 3  ;;  %v2370_v21 = vcombine.low %v687_v14, %v2966_v17  ;;  %vm673_vm9 = vmpackc.low %vm2987_vm7, %vm2987_vm7  ;;  %vm3030_vm12 = vcmp.eq.s32.totalorder %v362_v33, 0  ;;  %vm3046_vm14 = vcmp.eq.s32.totalorder %v376_v49, 0  ;;  %v2782_v14 = vld [vmem:[%s3802_s1 + $0x70] sm:$0xff]   ;;  %vm3096_vm3 = vcmp.eq.s32.totalorder %v390_v63, 0  ;;  %v2775_v49 = vld [vmem:[%s3802_s1 + $0x98] sm:$0xff]  }
   0xf   : > { %s2937_s11 = scalar_lea.vmem %s3801_s0, %s2495_s30  ;;  %2621 = vmatpush3.bf16.msra.mxu0 %v2758_v4  ;;  %v689_v36 = vsel %vm673_vm9, 65537, %v2870_v10  ;;  %vm675_vm11 = vmpackc.low %vm512_vm10, %vm512_vm10  ;;  %v305_v4 = vadd.s32 40, %v2925_v3  ;;  %s2361_s8 = sshll.u32 %s3887_s22, 2 }
  0x10   : > { %v2947_v9 = vld [vmem:[%s2937_s11] sm:$0xff]   ;;  %2622 = vmatprep.subr.bf16.mxu0 %v2759_v6  ;;  %v2969_v19 = vld [vmem:[%s2937_s11 + $0x8] sm:$0xff]   ;;  %vm2504_vm8 = vcmp.eq.s16.totalorder %v2370_v21, 0  ;;  %v3004_v32 = vld [vmem:[%s2937_s11 + $0x10] sm:$0xff]   ;;  %2589 = vmatpush3.bf16.msra.mxu1 %v2770_v27  ;;  %v691_v45 = vsel %vm675_vm11, 65537, %v2870_v10  ;;  %v2371_v47 = vcombine.low %v689_v36, %v2966_v17  ;;  %v314_v21 = vadd.s32 112, %v2925_v3  ;;  %s279_s12 = scalar_lea.vmem %s3807_s6, %s2361_s8 }
  0x11   : > { %v566_v12 = vshrl.u32 %v2947_v9, 16  ;;  %v569_v13 = vshll.u32 %v2947_v9, 16  ;;  %2600 = vmatprep.mubr.bf16.mxu1 %v2947_v9  ;;  %v573_v30 = vshrl.u32 %v2969_v19, 16  ;;  %v581_v35 = vshrl.u32 %v3004_v32, 16  ;;  %v3012_v37 = vld [vmem:[%s2937_s11 + $0x18] sm:$0xff]   ;;  %2590 = vmatprep.subr.bf16.mxu1 %v2774_v41  ;;  %v3040_v51 = vld [vmem:[%s2937_s11 + $0x20] sm:$0xff]   ;;  %vm677_vm13 = vmpackc.low %vm3030_vm12, %vm3030_vm12 }
  0x12   : > { %v576_v40 = vshll.u32 %v2969_v19, 16  ;;  %v584_v44 = vshll.u32 %v3004_v32, 16  ;;  %v589_v50 = vshrl.u32 %v3012_v37, 16  ;;  %v2372_v52 = vcombine.low %v691_v45, %v2966_v17  ;;  %vm679_vm0 = vmpackc.low %vm3046_vm14, %vm3046_vm14  ;;  %v3102_v20 = vld [vmem:[%s2937_s11 + $0x30] sm:$0xff]   ;;  %v2786_v36 = vld [vmem:[%s3802_s1 + $0x78] sm:$0xff]  }
  0x13   : > { %v2963_v16 = vrot.slane %v566_v12, 7  ;;  %2623 = vmatpush3.bf16.msra.mxu0 %v2759_v6  ;;  %v575_v39 = vrot.slane %v573_v30, 7  ;;  %v3026_v43 = vrot.slane %v581_v35, 7  ;;  %v597_v56 = vshrl.u32 %v3040_v51, 16  ;;  %v2773_v27 = vld [vmem:[%s3802_s1 + $0x90] sm:$0xff]   ;;  %vm681_vm4 = vmpackc.low %vm3096_vm3, %vm3096_vm3 }
  0x14   : > { %2624 = vmatprep.subr.bf16.mxu0 %v2760_v11  ;;  %2591 = vmatpush3.bf16.msra.mxu1 %v2774_v41  ;;  %vm3057_vm15 = vcmp.eq.s16.totalorder %v2371_v47, 0  ;;  %v592_v60 = vshll.u32 %v3012_v37, 16  ;;  %v591_v61 = vrot.slane %v589_v50, 7  ;;  %v693_v62 = vsel %vm677_vm13, 65537, %v2870_v10 }
  0x15   : > { %v571_v25 = vor.u32 %v569_v13, %v2963_v16  ;;  %2592 = vmatprep.subr.bf16.mxu1 %v2776_v48  ;;  %v578_v54 = vor.u32 %v576_v40, %v575_v39  ;;  %v586_v59 = vor.u32 %v584_v44, %v3026_v43  ;;  %vm3077_vm1 = vcmp.eq.s16.totalorder %v2372_v52, 0 }
  0x16   : > { %v600_v5 = vshll.u32 %v3040_v51, 16  ;;  %v3086_v7 = vrot.slane %v597_v56, 7  ;;  %v695_v8 = vsel %vm679_vm0, 65537, %v2870_v10  ;;  %v2373_v22 = vcombine.low %v693_v62, %v2966_v17 }
  0x17   : > { %v638_v29 = vsel %vm2974_vm6, 0, %v571_v25  ;;  %2625 = vmatpush3.bf16.msra.mxu0 %v2760_v11  ;;  %v579_v6 = vsel %vm564_vm2, %v2963_v16, %v578_v54  ;;  %v3090_v11 = vld [vmem:[%s2937_s11 + $0x28] sm:$0xff]   ;;  %v587_v15 = vsel %vm564_vm2, %v575_v39, %v586_v59  ;;  %v312_v16 = vadd.s32 96, %v2925_v3 }
  0x18   : > { %2632 = vmatprep.mubr.msk.bf16.mxu0 %vm2504_vm8, %v638_v29  ;;  %2626 = vmatprep.subr.bf16.mxu0 %v2761_v28  ;;  %v594_v24 = vor.u32 %v592_v60, %v591_v61  ;;  %v2374_v25 = vcombine.low %v695_v8, %v2966_v17  ;;  %v605_v26 = vshrl.u32 %v3090_v11, 16  ;;  %v613_v31 = vshrl.u32 %v3102_v20, 16 }
  0x19   : > { %2593 = vmatpush3.bf16.msra.mxu1 %v2776_v48  ;;  %v404_v23 = vand.u32 15, %v312_v16  ;;  %v418_v33 = vand.u32 15, %v314_v21  ;;  %vm3135_vm6 = vcmp.eq.s16.totalorder %v2373_v22, 0  ;;  %v608_v41 = vshll.u32 %v3090_v11, 16  ;;  %v2788_v48 = vld [vmem:[%s3804_s3] sm:$0xff]   ;;  %v2790_v22 = vld [vmem:[%s3804_s3 + $0x10] sm:$0xff]  }
  0x1a   : > { %2594 = vmatprep.subr.bf16.mxu1 %v2780_v0  ;;  %v595_v42 = vsel %vm564_vm2, %v3026_v43, %v594_v24  ;;  %vm3145_vm8 = vcmp.eq.s16.totalorder %v2374_v25, 0  ;;  %v607_v46 = vrot.slane %v605_v26, 7  ;;  %v697_v52 = vsel %vm681_vm4, 65537, %v2870_v10  ;;  %v2781_v24 = vld [vmem:[%s3802_s1 + $0xa8] sm:$0xff]  }
  0x1b   : > { %2627 = vmatpush3.bf16.msra.mxu0 %v2761_v28  ;;  %v602_v28 = vor.u32 %v600_v5, %v3086_v7  ;;  %vm3123_vm5 = vcmp.eq.s32.totalorder %v404_v23, 0  ;;  %v3166_v53 = vrot.slane %v613_v31, 7  ;;  %v616_v54 = vshll.u32 %v3102_v20, 16 }
  0x1c   : > { %2628 = vmatprep.subr.bf16.mxu0 %v2762_v34  ;;  %vm683_vm7 = vmpackc.low %vm3123_vm5, %vm3123_vm5  ;;  %vm3170_vm9 = vcmp.eq.s32.totalorder %v418_v33, 0  ;;  %v610_v62 = vor.u32 %v608_v41, %v607_v46  ;;  %v2375_v63 = vcombine.low %v697_v52, %v2966_v17  ;;  %v355_v21 = vand.u32 15, %v305_v4 }
  0x1d   : > { %2595 = vmatpush3.bf16.msra.mxu1 %v2780_v0  ;;  %v603_v43 = vsel %vm564_vm2, %v591_v61, %v602_v28  ;;  %v2789_v61 = vld [vmem:[%s3804_s3 + $0x8] sm:$0xff]   ;;  %v2779_v0 = vld [vmem:[%s3802_s1 + $0xa0] sm:$0xff]   ;;  %vm685_vm11 = vmpackc.low %vm3170_vm9, %vm3170_vm9  ;;  %v307_v9 = vadd.s32 56, %v2925_v3  ;;  %v762_v39 = vrot.slane %v576_v40, 1 }
  0x1e   : > { %2596 = vmatprep.subr.bf16.mxu1 %v2782_v14  ;;  %vm2509_vm13 = vcmp.eq.s16.totalorder %v2375_v63, 0  ;;  %v701_v23 = vsel %vm685_vm11, 65537, %v2870_v10  ;;  %vm3232_vm0 = vcmp.eq.s32.totalorder %v355_v21, 15 }
  0x1f   : > { %2629 = vmatpush3.bf16.msra.mxu0 %v2762_v34  ;;  %v3129_v34 = vld [vmem:[%s2937_s11 + $0x38] sm:$0xff]   ;;  %vm831_vm4 = vmpackc.low %vm3232_vm0, %vm3232_vm0  ;;  %v369_v52 = vand.u32 15, %v307_v9  ;;  %v764_v21 = vor.u32 %v762_v39, %v573_v30 }
  0x20   : > { %2630 = vmatprep.subr.bf16.mxu0 %v2763_v38  ;;  %v621_v59 = vshrl.u32 %v3129_v34, 16  ;;  %v624_v16 = vshll.u32 %v3129_v34, 16 }
  0x21   : > { %2597 = vmatpush3.bf16.msra.mxu1 %v2782_v14  ;;  %v760_v14 = vrot.slane %v569_v13, 1  ;;  %v611_v13 = vsel %vm564_vm2, %v3086_v7, %v610_v62 }
  0x22   : > { %2598 = vmatprep.subr.bf16.mxu1 %v2786_v36  ;;  %v623_v18 = vrot.slane %v621_v59, 7 }
  0x23   : > { %2631 = vmatpush3.bf16.msra.mxu0 %v2763_v38  ;;  %v301_v38 = vadd.s32 8, %v2925_v3  ;;  %v761_v28 = vor.u32 %v760_v14, %v566_v12  ;;  %v2791_v12 = vld [vmem:[%s3804_s3 + $0x18] sm:$0xff]   ;;  %v765_v14 = vrot.slane %v584_v44, 1 }
  0x24   : > { %2648 = vmatprep.subr.bf16.mxu0 %v2767_v55  ;;  %v626_v33 = vor.u32 %v624_v16, %v623_v18 }
  0x25   : > { %v327_v47 = vand.u32 15, %v301_v38  ;;  %2599 = vmatpush3.bf16.msra.mxu1 %v2786_v36  ;;  %v2377_v36 = vcombine.low %v701_v23, %v2966_v17  ;;  %v768_v23 = vrot.slane %v592_v60, 1 }
  0x26   : > { %2633 = vmatmul.mubr.msk.bf16.vlgmr.msra.gmra.mrb[0].mxu0 %vm3057_vm15, %v579_v6  ;;  %2680 = vmatprep.subr.bf16.mxu1 %v2788_v48  ;;  %v618_v6 = vor.u32 %v616_v54, %v3166_v53 }
  0x27   : > { %2649 = vmatpush3.bf16.msra.mxu0 %v2767_v55  ;;  %2636 = vmatprep.mubr.msk.bf16.mxu0 %vm3077_vm1, %v587_v15  ;;  %v699_v55 = vsel %vm683_vm7, 65537, %v2870_v10  ;;  %vm3189_vm10 = vcmp.eq.s32.totalorder %v327_v47, 15  ;;  %v341_v15 = vand.u32 15, %v303_v58  ;;  %v2785_v47 = vld [vmem:[%s3802_s1 + $0xb0] sm:$0xff]   ;;  %vm759_vm1 = vsmask.f32 7424 }
  0x28   : > { %2650 = vmatprep.subr.bf16.mxu0 %v2769_v2  ;;  %v2376_v8 = vcombine.low %v699_v55, %v2966_v17  ;;  %2601 = vmatmul.mubr.bf16.vlgmr.msra.gmra.mrb[0].mxu1 %v2969_v19  ;;  %vm827_vm12 = vmpackc.low %vm3189_vm10, %vm3189_vm10  ;;  %v619_v25 = vsel %vm564_vm2, %v607_v46, %v618_v6  ;;  %v313_v46 = vadd.s32 104, %v2925_v3  ;;  %v315_v55 = vadd.s32 120, %v2925_v3 }
  0x29   : > { %2604 = vmatprep.mubr.bf16.mxu1 %v3004_v32  ;;  %2681 = vmatpush3.bf16.msra.mxu1 %v2788_v48  ;;  %v843_v29 = vsel %vm827_vm12, 65537, %v2870_v10  ;;  %vm3225_vm15 = vcmp.eq.s32.totalorder %v341_v15, 15  ;;  %v763_v58 = vsel %vm759_vm1, %v761_v28, %v762_v39  ;;  %v847_v6 = vsel %vm831_vm4, 65537, %v2870_v10 }
  0x2a   : > { %2682 = vmatprep.subr.bf16.mxu1 %v2789_v61  ;;  %vm2510_vm14 = vcmp.eq.s16.totalorder %v2376_v8, 0  ;;  %v2378_v48 = vcombine.low %v2966_v17, %v843_v29  ;;  %vm829_vm3 = vmpackc.low %vm3225_vm15, %vm3225_vm15  ;;  %v411_v40 = vand.u32 15, %v313_v46  ;;  %v425_v4 = vand.u32 15, %v315_v55 }
  0x2b   : > { %2651 = vmatpush3.bf16.msra.mxu0 %v2769_v2  ;;  %vm3296_vm10 = vcmp.eq.s32.totalorder %v369_v52, 15  ;;  %v2380_v19 = vcombine.low %v2966_v17, %v847_v6  ;;  %v766_v32 = vsel %vm759_vm1, %v764_v21, %v765_v14  ;;  %v770_v28 = vor.u32 %v768_v23, %v589_v50 }
  0x2c   : > { %2652 = vmatprep.subr.bf16.mxu0 %v2773_v27  ;;  %vm758_vm11 = vcmp.eq.s32.totalorder %v425_v4, 15 }
  0x2d   : > { %2683 = vmatpush3.bf16.msra.mxu1 %v2789_v61 }
  0x2e   : > { %2637 = vmatmul.mubr.msk.bf16.gmra.mrb[4].mxu0 %vm3135_vm6, %v595_v42  ;;  %2684 = vmatprep.subr.bf16.mxu1 %v2790_v22  ;;  %v309_v42 = vadd.s32 72, %v2925_v3  ;;  %vm3258_vm6 = vcmp.eq.s16.totalorder %v2377_v36, 0 }
  0x2f   : > { %2653 = vmatpush3.bf16.msra.mxu0 %v2773_v27  ;;  %2640 = vmatprep.mubr.msk.bf16.mxu0 %vm3145_vm8, %v603_v43  ;;  %v311_v27 = vadd.s32 88, %v2925_v3  ;;  %vm3273_vm8 = vcmp.eq.s16.totalorder %v2378_v48, 0  ;;  %v3367_v43 = vld [vmem:[%s3803_s2] ss:$0 sm:$0xff] }
  0x30   : > { %2654 = vmatprep.subr.bf16.mxu0 %v2775_v49  ;;  %2605 = vmatmul.mubr.bf16.gmra.mrb[4].mxu1 %v3012_v37  ;;  %v383_v61 = vand.u32 15, %v309_v42  ;;  %v777_v37 = vrot.slane %v616_v54, 1 }
  0x31   : > { %v397_v45 = vand.u32 15, %v311_v27  ;;  %2608 = vmatprep.mubr.bf16.mxu1 %v3040_v51  ;;  %2685 = vmatpush3.bf16.msra.mxu1 %v2790_v22  ;;  %v771_v27 = vrot.slane %v600_v5, 1 }
  0x32   : > { %2686 = vmatprep.subr.bf16.mxu1 %v2791_v12  ;;  %vm3306_vm12 = vcmp.eq.s32.totalorder %v383_v61, 15  ;;  %v779_v51 = vor.u32 %v777_v37, %v613_v31  ;;  %v2795_v31 = vld [vmem:[%s3804_s3 + $0x38] sm:$0xff]  }
  0x33   : > { %2655 = vmatpush3.bf16.msra.mxu0 %v2775_v49  ;;  %vm754_vm5 = vcmp.eq.s32.totalorder %v397_v45, 15  ;;  %v627_v49 = vsel %vm564_vm2, %v3166_v53, %v626_v33  ;;  %vm756_vm2 = vcmp.eq.s32.totalorder %v411_v40, 15  ;;  %v2787_v53 = vld [vmem:[%s3802_s1 + $0xb8] sm:$0xff]   ;;  %vm835_vm15 = vmpackc.low %vm3306_vm12, %vm3306_vm12  ;;  %v773_v7 = vor.u32 %v771_v27, %v597_v56 }
  0x34   : > { %2656 = vmatprep.subr.bf16.mxu0 %v2779_v0  ;;  %vm837_vm7 = vmpackc.low %vm754_vm5, %vm754_vm5  ;;  %v774_v33 = vrot.slane %v608_v41, 1  ;;  %vm1789_vm12 = vcmask 1043459  }
  0x35   : > { %v3268_v62 = vsel %vm837_vm7, 65537, %v2870_v10  ;;  %vm839_vm9 = vmpackc.low %vm756_vm2, %vm756_vm2  ;;  %2687 = vmatpush3.bf16.msra.mxu1 %v2791_v12  ;;  %vm791_vm2 = vcmask 1047552  }
  0x36   : > { %2641 = vmatmul.mubr.msk.bf16.gmra.mrb[8].mxu0 %vm2509_vm13, %v611_v13  ;;  %v2383_v2 = vcombine.low %v2966_v17, %v3268_v62  ;;  %v855_v8 = vsel %vm839_vm9, 65537, %v2870_v10  ;;  %2688 = vmatprep.subr.bf16.mxu1 %v2792_v57  ;;  %vm841_vm13 = vmpackc.low %vm758_vm11, %vm758_vm11  ;;  %v767_v13 = vor.u32 %v765_v14, %v581_v35  ;;  %v775_v5 = vsel %vm759_vm1, %v773_v7, %v774_v33 }
  0x37   : > { %2657 = vmatpush3.bf16.msra.mxu0 %v2779_v0  ;;  %2644 = vmatprep.mubr.msk.bf16.mxu0 %vm2510_vm14, %v619_v25  ;;  %v845_v0 = vsel %vm829_vm3, 65537, %v2870_v10  ;;  %v2384_v18 = vcombine.low %v2966_v17, %v855_v8  ;;  %v857_v30 = vsel %vm841_vm13, 65537, %v2870_v10  ;;  %vm833_vm14 = vmpackc.low %vm3296_vm10, %vm3296_vm10  ;;  %vm2514_vm3 = vcmp.eq.s16.totalorder %v2380_v19, 0 }
  0x38   : > { %2658 = vmatprep.subr.bf16.mxu0 %v2781_v24  ;;  %v2379_v44 = vcombine.low %v2966_v17, %v845_v0  ;;  %2609 = vmatmul.mubr.bf16.gmra.mrb[8].mxu1 %v3090_v11  ;;  %v769_v35 = vsel %vm759_vm1, %v767_v13, %v768_v23  ;;  %v849_v60 = vsel %vm833_vm14, 65537, %v2870_v10  ;;  %v851_v25 = vsel %vm835_vm15, 65537, %v2870_v10 }
  0x39   : > { %2612 = vmatprep.mubr.bf16.mxu1 %v3102_v20  ;;  %2689 = vmatpush3.bf16.msra.mxu1 %v2792_v57  ;;  %v2381_v29 = vcombine.low %v2966_v17, %v849_v60  ;;  %v2382_v36 = vcombine.low %v2966_v17, %v851_v25  ;;  %v772_v10 = vsel %vm759_vm1, %v770_v28, %v771_v27  ;;  %vm2518_vm7 = vcmp.eq.s16.totalorder %v2384_v18, 0  ;;  %v2793_v20 = vld [vmem:[%s3804_s3 + $0x28] sm:$0xff]  }
  0x3a   : > { %vm2513_vm0 = vcmp.eq.s16.totalorder %v2379_v44, 0  ;;  %v776_v50 = vor.u32 %v774_v33, %v605_v26  ;;  %2690 = vmatprep.subr.bf16.mxu1 %v2793_v20  ;;  %v2794_v26 = vld [vmem:[%s3804_s3 + $0x30] sm:$0xff]   ;;  %vm1785_vm10 = vcmask 1041409   ;;  %vm1787_vm11 = vcmask 1042434  }
  0x3b   : > { %2659 = vmatpush3.bf16.msra.mxu0 %v2781_v24  ;;  %v2385_v24 = vcombine.low %v2966_v17, %v857_v30  ;;  %vm2515_vm4 = vcmp.eq.s16.totalorder %v2381_v29, 0  ;;  %vm2516_vm5 = vcmp.eq.s16.totalorder %v2382_v36, 0  ;;  %v780_v17 = vrot.slane %v624_v16, 1 }
  0x3c   : > { %2660 = vmatprep.subr.bf16.mxu0 %v2785_v47  ;;  %v778_v56 = vsel %vm759_vm1, %v776_v50, %v777_v37  ;;  %vm1791_vm13 = vcmask 1044484   ;;  %vm1793_vm14 = vcmask 1045509   ;;  %vm1795_vm15 = vcmask 1046534  }
  0x3d   : > { %v781_v41 = vsel %vm759_vm1, %v779_v51, %v780_v17  ;;  %v782_v54 = vor.u32 %v780_v17, %v621_v59  ;;  %vm2519_vm9 = vcmp.eq.s16.totalorder %v2385_v24, 0  ;;  %2691 = vmatpush3.bf16.msra.mxu1 %v2793_v20 }
  0x3e   : > { %2645 = vmatmul.mubr.msk.bf16.gmra.mrb[12].mxu0 %vm3258_vm6, %v627_v49  ;;  %vm2517_vm6 = vcmp.eq.s16.totalorder %v2383_v2, 0  ;;  %2692 = vmatprep.subr.bf16.mxu1 %v2794_v26 }
  0x3f   : > { %2661 = vmatpush3.bf16.msra.mxu0 %v2785_v47  ;;  %2664 = vmatprep.mubr.msk.bf16.mxu0 %vm3273_vm8, %v763_v58  ;;  %vm792_vm8 = vmand %vm791_vm2, %vm759_vm1  ;;  %vm1720_vm1 = vcmask 130112  }
  0x40   : > { %2662 = vmatprep.subr.bf16.mxu0 %v2787_v53  ;;  %2613 = vmatmul.mubr.bf16.gmra.mrb[12].mxu1 %v3129_v34  ;;  %v793_v11 = vsel %vm792_vm8, %v782_v54, 0 }
  0x41   : > { %2693 = vmatpush3.bf16.msra.mxu1 %v2794_v26 }
  0x42   : > { %2694 = vmatprep.subr.bf16.mxu1 %v2795_v31 }
  0x43   : > { %2663 = vmatpush3.bf16.msra.mxu0 %v2787_v53 }
  0x45   : > { %2695 = vmatpush3.bf16.msra.mxu1 %v2795_v31 }
  0x46   : > { %2665 = vmatmul.mubr.msk.bf16.vlgmr.msra.gmra.mrb[0].mxu0 %vm2513_vm0, %v766_v32  ;;  %vm1797_vm0 = vcmask 1047559  }
  0x47   : > { %2668 = vmatprep.mubr.msk.bf16.mxu0 %vm2514_vm3, %v769_v35  ;;  %vm1800_vm3 = vcmask 130048  }
  0x4e   : > { %2669 = vmatmul.mubr.msk.bf16.gmra.mrb[4].mxu0 %vm2515_vm4, %v772_v10 }
  0x4f   : > { %2672 = vmatprep.mubr.msk.bf16.mxu0 %vm2516_vm5, %v775_v5 }
  0x56   : > { %2673 = vmatmul.mubr.msk.bf16.gmra.mrb[8].mxu0 %vm2517_vm6, %v778_v56 }
  0x57   : > { %2676 = vmatprep.mubr.msk.bf16.mxu0 %vm2518_vm7, %v781_v41 }
  0x5e   : > { %2677 = vmatmul.mubr.msk.bf16.gmra.mrb[12].mxu0 %vm2519_vm9, %v793_v11 }
  0xfb   : > { %v2602_v34 = vpop.f32.mrb[0].mxu1 }
  0xfc   : > { %v1021_v59 = vpop.f32.mrb[1].mxu1 }
  0xfd   : > { %v2603_v16 = vpop.f32.mrb[2].mxu1 }
  0xfe   : > { %v1024_v38 = vpop.f32.mrb[3].mxu1 }
 0x103   : > { %v2606_v9 = vpop.f32.mrb[4].mxu1 }
 0x104   : > { %v1037_v12 = vpop.f32.mrb[5].mxu1 }
 0x105   : > { %v2607_v39 = vpop.f32.mrb[6].mxu1 }
 0x106   : > { %v1040_v42 = vpop.f32.mrb[7].mxu1 }
 0x10b   : > { %v2610_v45 = vpop.f32.mrb[8].mxu1 }
 0x10c   : > { %v1053_v46 = vpop.f32.mrb[9].mxu1 }
 0x10d   : > { %v2611_v47 = vpop.f32.mrb[10].mxu1 }
 0x10e   : > { %v1056_v48 = vpop.f32.mrb[11].mxu1 }
 0x113   : > { %v2614_v58 = vpop.f32.mrb[12].mxu1 }
 0x114   : > { %v1069_v53 = vpop.f32.mrb[13].mxu1 }
 0x115   : > { %v2615_v2 = vpop.f32.mrb[14].mxu1 }
 0x116   : > { %v1072_v8 = vpop.f32.mrb[15].mxu1 }
 0x119   : > { %v2666_v40 = vpop.f32.mrb[0].mxu0 }
 0x11a   : > { %v2712_v49 = vadd.f32 %v2666_v40, %v2602_v34  ;;  %v1328_v52 = vpop.f32.mrb[1].mxu0 }
 0x11b   : > { %v2713_v55 = vadd.f32 %v1328_v52, %v1021_v59  ;;  %v2667_v57 = vpop.f32.mrb[2].mxu0 }
 0x11c   : > { %v2714_v61 = vadd.f32 %v2667_v57, %v2603_v16  ;;  %v1331_v62 = vpop.f32.mrb[3].mxu0  ;;  %v3373_v4 = vadd.f32 %v2712_v49, %v3367_v43 }
 0x11d   : > { %v3370_v63 = vadd.f32 %v2713_v55, %v3367_v43  ;;  %v2715_v0 = vadd.f32 %v1331_v62, %v1024_v38 }
 0x11e   : > { %v3376_v6 = vadd.f32 %v2714_v61, %v3367_v43  ;;  %v3820_v22 = vmax.f32 %v3373_v4, 0.0 }
 0x11f   : > { %v3379_v14 = vadd.f32 %v2715_v0, %v3367_v43  ;;  %v3818_v18 = vmax.f32 %v3370_v63, 0.0 }
 0x120   : > { %v3823_v15 = vmax.f32 %v3376_v6, 0.0 }
 0x121   : > { %v3822_v21 = vmax.f32 %v3379_v14, 0.0  ;;  %v2670_v44 = vpop.f32.mrb[4].mxu0 }
 0x122   : > { %v2716_v13 = vadd.f32 %v2670_v44, %v2606_v9  ;;  %v1344_v23 = vpop.f32.mrb[5].mxu0  ;;  %v1447_v32 = vpack.c.bf16 %v3823_v15, %v3820_v22 }
 0x123   : > { %v2717_v19 = vadd.f32 %v1344_v23, %v1037_v12  ;;  %v2671_v30 = vpop.f32.mrb[6].mxu0  ;;  %v1446_v24 = vpack.c.bf16 %v3822_v21, %v3818_v18 }
 0x124   : > { %v2718_v35 = vadd.f32 %v2671_v30, %v2607_v39  ;;  %v1347_v60 = vpop.f32.mrb[7].mxu0  ;;  %v3397_v28 = vadd.f32 %v2716_v13, %v3367_v43 }
 0x125   : > { %v3394_v25 = vadd.f32 %v2717_v19, %v3367_v43  ;;  %v2719_v27 = vadd.f32 %v1347_v60, %v1040_v42  ;;  %2696 = vmatprep.mubr.bf16.mxu1 %v1446_v24 }
 0x126   : > { %v3400_v29 = vadd.f32 %v2718_v35, %v3367_v43  ;;  %2697 = vmatmul.mubr.bf16.vlgmr.msra.gmra.mrb[16].mxu1 %v1447_v32  ;;  %v3816_v37 = vmax.f32 %v3397_v28, 0.0 }
 0x127   : > { %v3403_v7 = vadd.f32 %v2719_v27, %v3367_v43  ;;  %v3817_v36 = vmax.f32 %v3394_v25, 0.0 }
 0x128   : > { %v3819_v33 = vmax.f32 %v3400_v29, 0.0 }
 0x129   : > { %v3821_v10 = vmax.f32 %v3403_v7, 0.0  ;;  %v2674_v5 = vpop.f32.mrb[8].mxu0 }
 0x12a   : > { %v2720_v50 = vadd.f32 %v2674_v5, %v2610_v45  ;;  %v1360_v51 = vpop.f32.mrb[9].mxu0  ;;  %v1449_v20 = vpack.c.bf16 %v3819_v33, %v3816_v37 }
 0x12b   : > { %v2721_v17 = vadd.f32 %v1360_v51, %v1053_v46  ;;  %v2675_v56 = vpop.f32.mrb[10].mxu0  ;;  %v1448_v41 = vpack.c.bf16 %v3821_v10, %v3817_v36 }
 0x12c   : > { %v2722_v54 = vadd.f32 %v2675_v56, %v2611_v47  ;;  %v1363_v11 = vpop.f32.mrb[11].mxu0  ;;  %v3421_v34 = vadd.f32 %v2720_v50, %v3367_v43 }
 0x12d   : > { %v3418_v26 = vadd.f32 %v2721_v17, %v3367_v43  ;;  %v2723_v31 = vadd.f32 %v1363_v11, %v1056_v48  ;;  %2700 = vmatprep.mubr.bf16.mxu1 %v1448_v41 }
 0x12e   : > { %v3424_v59 = vadd.f32 %v2722_v54, %v3367_v43  ;;  %2701 = vmatmul.mubr.bf16.gmra.mrb[20].mxu1 %v1449_v20  ;;  %v3813_v42 = vmax.f32 %v3421_v34, 0.0  ;;  %v3480_v20 = vld [vmem:[%s3806_s5] ss:$0 sm:$0xff] }
 0x12f   : > { %v3427_v16 = vadd.f32 %v2723_v31, %v3367_v43  ;;  %v3815_v9 = vmax.f32 %v3418_v26, 0.0 }
 0x130   : > { %v3812_v38 = vmax.f32 %v3424_v59, 0.0 }
 0x131   : > { %v3814_v12 = vmax.f32 %v3427_v16, 0.0  ;;  %v2678_v39 = vpop.f32.mrb[12].mxu0 }
 0x132   : > { %v2724_v45 = vadd.f32 %v2678_v39, %v2614_v58  ;;  %v1376_v46 = vpop.f32.mrb[13].mxu0  ;;  %v1451_v55 = vpack.c.bf16 %v3812_v38, %v3813_v42 }
 0x133   : > { %v2725_v47 = vadd.f32 %v1376_v46, %v1069_v53  ;;  %v2679_v48 = vpop.f32.mrb[14].mxu0  ;;  %v1450_v40 = vpack.c.bf16 %v3814_v12, %v3815_v9 }
 0x134   : > { %v2726_v49 = vadd.f32 %v2679_v48, %v2615_v2  ;;  %v1379_v52 = vpop.f32.mrb[15].mxu0  ;;  %v3445_v58 = vadd.f32 %v2724_v45, %v3367_v43 }
 0x135   : > { %v3442_v57 = vadd.f32 %v2725_v47, %v3367_v43  ;;  %v2727_v61 = vadd.f32 %v1379_v52, %v1072_v8  ;;  %2704 = vmatprep.mubr.bf16.mxu1 %v1450_v40 }
 0x136   : > { %v3448_v62 = vadd.f32 %v2726_v49, %v3367_v43  ;;  %2705 = vmatmul.mubr.bf16.gmra.mrb[24].mxu1 %v1451_v55  ;;  %v3809_v13 = vmax.f32 %v3445_v58, 0.0 }
 0x137   : > { %v3451_v53 = vadd.f32 %v2727_v61, %v3367_v43  ;;  %v3811_v2 = vmax.f32 %v3442_v57, 0.0  ;;  %v3468_v43 = vld [vmem:[%s3805_s4] ss:$0 sm:$0xff] }
 0x138   : > { %v3808_v0 = vmax.f32 %v3448_v62, 0.0 }
 0x139   : > { %v3810_v44 = vmax.f32 %v3451_v53, 0.0 }
 0x13a   : > { %v1453_v23 = vpack.c.bf16 %v3808_v0, %v3809_v13 }
 0x13b   : > { %v1452_v8 = vpack.c.bf16 %v3810_v44, %v3811_v2 }
 0x13d   : > { %2708 = vmatprep.mubr.bf16.mxu1 %v1452_v8 }
 0x13e   : > { %2709 = vmatmul.mubr.bf16.gmra.mrb[28].mxu1 %v1453_v23 }
 0x1f9   : > { %v2698_v19 = vpop.f32.mrb[16].mxu1 }
 0x1fa   : > { %v1568_v30 = vadd.f32 %v2698_v19, %v3468_v43  ;;  %v1559_v24 = vpop.f32.mrb[17].mxu1 }
 0x1fb   : > { %v1560_v32 = vadd.f32 %v3468_v43, %v1559_v24  ;;  %v2699_v35 = vpop.f32.mrb[18].mxu1 }
 0x1fc   : > { %2796 = vtanh.f32 %v1568_v30  ;;  %v1571_v60 = vadd.f32 %v2699_v35, %v3468_v43  ;;  %v1562_v27 = vpop.f32.mrb[19].mxu1 }
 0x1fd   : > { %2798 = vtanh.f32 %v1560_v32  ;;  %v1563_v5 = vadd.f32 %v3468_v43, %v1562_v27 }
 0x1fe   : > { %2800 = vtanh.f32 %v1571_v60 }
 0x1ff   : > { %2802 = vtanh.f32 %v1563_v5 }
 0x201   : > { %v2702_v50 = vpop.f32.mrb[20].mxu1 }
 0x202   : > { %v1584_v51 = vadd.f32 %v2702_v50, %v3468_v43  ;;  %v1575_v17 = vpop.f32.mrb[21].mxu1 }
 0x203   : > { %v1576_v56 = vadd.f32 %v3468_v43, %v1575_v17  ;;  %v2703_v41 = vpop.f32.mrb[22].mxu1 }
 0x204   : > { %2804 = vtanh.f32 %v1584_v51  ;;  %v1587_v54 = vadd.f32 %v2703_v41, %v3468_v43  ;;  %v1578_v11 = vpop.f32.mrb[23].mxu1 }
 0x205   : > { %v1579_v31 = vadd.f32 %v3468_v43, %v1578_v11 }
 0x206   : > { %v2797_v39 = vpop.eup %2796  ;;  %2806 = vtanh.f32 %v1587_v54 }
 0x207   : > { %v2799_v45 = vpop.eup %2798  ;;  %2808 = vtanh.f32 %v1576_v56  ;;  %v1647_v46 = vmul.f32 %v2797_v39, %v3480_v20 }
 0x208   : > { %v2801_v47 = vpop.eup %2800  ;;  %2810 = vtanh.f32 %v1579_v31  ;;  %v1645_v48 = vmul.f32 %v2799_v45, %v3480_v20 }
 0x209   : > { %v2803_v40 = vpop.eup %2802  ;;  %1665 = vadd.xlane.f32.xlu1 %v1647_v46  ;;  %v2706_v49 = vpop.f32.mrb[24].mxu1  ;;  %v1648_v23 = vmul.f32 %v2801_v47, %v3480_v20 }
 0x20a   : > { %v1600_v52 = vadd.f32 %v2706_v49, %v3468_v43  ;;  %1661 = vadd.xlane.f32.xlu0 %v1645_v48  ;;  %v1591_v55 = vpop.f32.mrb[25].mxu1  ;;  %v1646_v24 = vmul.f32 %v2803_v40, %v3480_v20 }
 0x20b   : > { %v1592_v61 = vadd.f32 %v3468_v43, %v1591_v55  ;;  %v2707_v8 = vpop.f32.mrb[26].mxu1 }
 0x20c   : > { %2812 = vtanh.f32 %v1600_v52  ;;  %v1603_v19 = vadd.f32 %v2707_v8, %v3468_v43  ;;  %v1594_v30 = vpop.f32.mrb[27].mxu1 }
 0x20d   : > { %v1595_v32 = vadd.f32 %v3468_v43, %v1594_v30  ;;  %1667 = vadd.xlane.f32.xlu1 %v1648_v23 }
 0x20e   : > { %v2805_v35 = vpop.eup %2804  ;;  %2814 = vtanh.f32 %v1603_v19  ;;  %1663 = vadd.xlane.f32.xlu0 %v1646_v24 }
 0x20f   : > { %2816 = vtanh.f32 %v1592_v61  ;;  %v1651_v60 = vmul.f32 %v2805_v35, %v3480_v20 }
 0x210   : > { %v2807_v27 = vpop.eup %2806  ;;  %2818 = vtanh.f32 %v1595_v32 }
 0x211   : > { %v2809_v5 = vpop.eup %2808  ;;  %v2710_v50 = vpop.f32.mrb[28].mxu1  ;;  %v1652_v51 = vmul.f32 %v2807_v27, %v3480_v20 }
 0x212   : > { %v2811_v17 = vpop.eup %2810  ;;  %v1616_v56 = vadd.f32 %v2710_v50, %v3468_v43  ;;  %1673 = vadd.xlane.f32.xlu0 %v1651_v60  ;;  %v1607_v41 = vpop.f32.mrb[29].mxu1  ;;  %v1649_v39 = vmul.f32 %v2809_v5, %v3480_v20 }
 0x213   : > { %v1608_v54 = vadd.f32 %v3468_v43, %v1607_v41  ;;  %1675 = vadd.xlane.f32.xlu1 %v1652_v51  ;;  %v2711_v11 = vpop.f32.mrb[30].mxu1  ;;  %v1650_v47 = vmul.f32 %v2811_v17, %v3480_v20 }
 0x214   : > { %v1610_v31 = vpop.f32.mrb[31].mxu1  ;;  %v1619_v45 = vadd.f32 %v2711_v11, %v3468_v43 }
 0x215   : > { %2820 = vtanh.f32 %v1608_v54  ;;  %v1611_v46 = vadd.f32 %v3468_v43, %v1610_v31 }
 0x216   : > { %v2813_v48 = vpop.eup %2812  ;;  %2822 = vtanh.f32 %v1616_v56  ;;  %1669 = vadd.xlane.f32.xlu0 %v1649_v39  ;;  %v1710_v56 = vand.u32 127, %v299_v1 }
 0x217   : > { %2824 = vtanh.f32 %v1611_v46  ;;  %1671 = vadd.xlane.f32.xlu1 %v1650_v47  ;;  %v1655_v40 = vmul.f32 %v2813_v48, %v3480_v20 }
 0x218   : > { %v2815_v49 = vpop.eup %2814  ;;  %2826 = vtanh.f32 %v1619_v45  ;;  %v1715_v54 = vadd.s32 4294967288, %v1710_v56  ;;  %v3528_v45 = vsub.s32 %v1710_v56, %v2925_v3 }
 0x219   : > { %v2817_v52 = vpop.eup %2816  ;;  %v1656_v55 = vmul.f32 %v2815_v49, %v3480_v20 }
 0x21a   : > { %v2819_v61 = vpop.eup %2818  ;;  %1681 = vadd.xlane.f32.xlu0 %v1655_v40  ;;  %v1653_v8 = vmul.f32 %v2817_v52, %v3480_v20 }
 0x21b   : > { %1683 = vadd.xlane.f32.xlu1 %v1656_v55  ;;  %v1654_v43 = vmul.f32 %v2819_v61, %v3480_v20 }
 0x21e   : > { %1677 = vadd.xlane.f32.xlu0 %v1653_v8 }
 0x21f   : > { %v2821_v23 = vpop.eup %2820  ;;  %1679 = vadd.xlane.f32.xlu1 %v1654_v43 }
 0x220   : > { %v2823_v19 = vpop.eup %2822  ;;  %v1657_v30 = vmul.f32 %v2821_v23, %v3480_v20 }
 0x221   : > { %v2825_v24 = vpop.eup %2824  ;;  %v1659_v60 = vmul.f32 %v2823_v19, %v3480_v20 }
 0x222   : > { %1685 = vadd.xlane.f32.xlu0 %v1657_v30  ;;  %v1658_v32 = vmul.f32 %v2825_v24, %v3480_v20  ;;  %v2827_v35 = vpop.eup %2826 }
 0x223   : > { %v1660_v27 = vmul.f32 %v2827_v35, %v3480_v20  ;;  %v3523_v20 = vsub.s32 %v1715_v54, %v2925_v3 }
 0x224   : > { %1687 = vadd.xlane.f32.xlu1 %v1658_v32 }
 0x226   : > { %1689 = vadd.xlane.f32.xlu0 %v1659_v60 }
 0x228   : > { %1691 = vadd.xlane.f32.xlu1 %v1660_v27 }
 0x296   : > { %v3507_v5 = vpop.xlane.xlu1 %1665 }
 0x297   : > { %v3509_v50 = vpop.xlane.xlu0 %1661  ;;  %v1725_v52 = vrot.slane %v3507_v5, %v3528_v45 }
 0x298   : > { %v1714_v55 = vrot.slane %v3509_v50, %v3528_v45 }
 0x29a   : > { %v3513_v17 = vpop.xlane.xlu1 %1667 }
 0x29b   : > { %v3511_v51 = vpop.xlane.xlu0 %1663  ;;  %v1729_v1 = vrot.slane %v3513_v17, %v3523_v20 }
 0x29c   : > { %v1719_v47 = vrot.slane %v3511_v51, %v3523_v20 }
 0x29d   : > { %v1730_v8 = vsel %vm1720_vm1, %v1729_v1, %v1725_v52 }
 0x29e   : > { %v1721_v43 = vsel %vm1720_vm1, %v1719_v47, %v1714_v55 }
 0x29f   : > { %v3516_v41 = vpop.xlane.xlu0 %1673  ;;  %v1786_v60 = vsel %vm1785_vm10, %v1730_v8, %v1721_v43 }
 0x2a0   : > { %v3518_v11 = vpop.xlane.xlu1 %1675  ;;  %v1743_v32 = vrot.slane %v3516_v41, %v3528_v45 }
 0x2a1   : > { %v1747_v35 = vrot.slane %v3518_v11, %v3523_v20 }
 0x2a3   : > { %v3520_v31 = vpop.xlane.xlu0 %1669  ;;  %v1748_v47 = vsel %vm1720_vm1, %v1747_v35, %v1743_v32 }
 0x2a4   : > { %v3525_v39 = vpop.xlane.xlu1 %1671  ;;  %v1734_v40 = vrot.slane %v3520_v31, %v3528_v45 }
 0x2a5   : > { %v1738_v49 = vrot.slane %v3525_v39, %v3523_v20 }
 0x2a7   : > { %v3530_v46 = vpop.xlane.xlu0 %1681  ;;  %v1739_v19 = vsel %vm1720_vm1, %v1738_v49, %v1734_v40 }
 0x2a8   : > { %v3536_v48 = vpop.xlane.xlu1 %1683  ;;  %v1788_v56 = vsel %vm1787_vm11, %v1739_v19, %v1786_v60  ;;  %v1761_v40 = vrot.slane %v3530_v46, %v3528_v45 }
 0x2a9   : > { %v1765_v49 = vrot.slane %v3536_v48, %v3523_v20  ;;  %v1790_v43 = vsel %vm1789_vm12, %v1748_v47, %v1788_v56 }
 0x2ab   : > { %v3546_v61 = vpop.xlane.xlu0 %1677  ;;  %v1766_v32 = vsel %vm1720_vm1, %v1765_v49, %v1761_v40  ;;  %v1807_v40 = vsub.s32 0, %v2925_v3  ;;  %v1811_v49 = vsub.s32 1, %v2925_v3 }
 0x2ac   : > { %v3550_v23 = vpop.xlane.xlu1 %1679  ;;  %v1752_v30 = vrot.slane %v3546_v61, %v3528_v45 }
 0x2ad   : > { %v1756_v24 = vrot.slane %v3550_v23, %v3523_v20 }
 0x2af   : > { %v3562_v27 = vpop.xlane.xlu0 %1685  ;;  %v1757_v54 = vsel %vm1720_vm1, %v1756_v24, %v1752_v30 }
 0x2b0   : > { %v1770_v55 = vrot.slane %v3562_v27, %v3528_v45  ;;  %v1792_v19 = vsel %vm1791_vm13, %v1757_v54, %v1790_v43 }
 0x2b1   : > { %v3566_v1 = vpop.xlane.xlu1 %1687  ;;  %v1794_v0 = vsel %vm1793_vm14, %v1766_v32, %v1792_v19  ;;  %v3825_v32 = vsub.s32 5, %v2925_v3 }
 0x2b2   : > { %v1774_v52 = vrot.slane %v3566_v1, %v3523_v20 }
 0x2b3   : > { %v3577_v8 = vpop.xlane.xlu0 %1689 }
 0x2b4   : > { %v1775_v24 = vsel %vm1720_vm1, %v1774_v52, %v1770_v55  ;;  %v1779_v35 = vrot.slane %v3577_v8, %v3528_v45 }
 0x2b5   : > { %v3581_v30 = vpop.xlane.xlu1 %1691  ;;  %v1796_v54 = vsel %vm1795_vm15, %v1775_v24, %v1794_v0 }
 0x2b6   : > { %v1783_v60 = vrot.slane %v3581_v30, %v3523_v20 }
 0x2b8   : > { %v1784_v56 = vsel %vm1720_vm1, %v1783_v60, %v1779_v35  ;;  %v1815_v35 = vsub.s32 2, %v2925_v3 }
 0x2b9   : > { %v1798_v47 = vsel %vm1797_vm0, %v1784_v56, %v1796_v54  ;;  %v3824_v56 = vsub.s32 6, %v2925_v3 }
 0x2ba   : > { %v1801_v52 = vsel %vm1800_vm3, %v1798_v47, -inf }
 0x2bb   : > { %1802 = vmax.xlane.f32.xlu0 %v1801_v52 }
 0x348   : > { %v1803_v55 = vpop.xlane.xlu0 %1802 }
 0x349   : > { %v1808_v43 = vrot.slane %v1803_v55, %v1807_v40  ;;  %v1812_v19 = vrot.slane %v1803_v55, %v1811_v49  ;;  %v3608_v54 = vrot.slane %v1803_v55, %v3825_v32  ;;  %v1816_v13 = vrot.slane %v1803_v55, %v1815_v35 }
 0x34b   : > { %v1845_v0 = vsub.f32 %v3509_v50, %v1808_v43  ;;  %v1846_v24 = vsub.f32 %v3511_v51, %v1808_v43  ;;  %v1847_v60 = vsub.f32 %v3507_v5, %v1812_v19  ;;  %v1848_v44 = vsub.f32 %v3513_v17, %v1812_v19 }
 0x34c   : > { %v1835_v51 = vsub.s32 7, %v2925_v3  ;;  %v3616_v5 = vrot.slane %v1803_v55, %v3824_v56  ;;  %v1855_v43 = vsub.f32 %v3530_v46, %v3608_v54 }
 0x34d   : > { %v1861_v47 = vmul.f32 1.442695, %v1845_v0  ;;  %v1863_v52 = vmul.f32 1.442695, %v1846_v24  ;;  %v1865_v50 = vmul.f32 1.442695, %v1847_v60  ;;  %v1849_v24 = vsub.f32 %v3520_v31, %v1816_v13 }
 0x34e   : > { %v3826_v0 = vsub.s32 3, %v2925_v3  ;;  %v1867_v2 = vmul.f32 1.442695, %v1848_v44  ;;  %v1836_v17 = vrot.slane %v1803_v55, %v1835_v51  ;;  %v1857_v19 = vsub.f32 %v3562_v27, %v3616_v5 }
 0x34f   : > { %2828 = vpow2.f32 %v1861_v47  ;;  %v1881_v60 = vmul.f32 1.442695, %v1855_v43  ;;  %v1869_v46 = vmul.f32 1.442695, %v1849_v24  ;;  %v1823_v27 = vsub.s32 4, %v2925_v3 }
 0x350   : > { %2830 = vpow2.f32 %v1863_v52  ;;  %v1820_v47 = vrot.slane %v1803_v55, %v3826_v0  ;;  %v1850_v52 = vsub.f32 %v3525_v39, %v1816_v13  ;;  %v1859_v31 = vsub.f32 %v3577_v8, %v1836_v17 }
 0x351   : > { %2832 = vpow2.f32 %v1865_v50  ;;  %v1885_v44 = vmul.f32 1.442695, %v1857_v19  ;;  %v1824_v39 = vrot.slane %v1803_v55, %v1823_v27 }
 0x352   : > { %2834 = vpow2.f32 %v1867_v2  ;;  %v1851_v43 = vsub.f32 %v3516_v41, %v1820_v47  ;;  %v1871_v42 = vmul.f32 1.442695, %v1850_v52  ;;  %v1889_v13 = vmul.f32 1.442695, %v1859_v31 }
 0x353   : > { %2836 = vpow2.f32 %v1881_v60  ;;  %v1852_v8 = vsub.f32 %v3518_v11, %v1820_v47  ;;  %v1853_v60 = vsub.f32 %v3546_v61, %v1824_v39  ;;  %v1856_v31 = vsub.f32 %v3536_v48, %v3608_v54 }
 0x354   : > { %2838 = vpow2.f32 %v1869_v46  ;;  %v1873_v24 = vmul.f32 1.442695, %v1851_v43 }
 0x355   : > { %2840 = vpow2.f32 %v1885_v44  ;;  %v1875_v52 = vmul.f32 1.442695, %v1852_v8  ;;  %v1877_v55 = vmul.f32 1.442695, %v1853_v60  ;;  %v1860_v8 = vsub.f32 %v3581_v30, %v1836_v17 }
 0x356   : > { %2842 = vpow2.f32 %v1871_v42  ;;  %v1854_v42 = vsub.f32 %v3550_v23, %v1824_v39  ;;  %v1858_v23 = vsub.f32 %v3566_v1, %v3616_v5 }
 0x357   : > { %2844 = vpow2.f32 %v1889_v13  ;;  %v1883_v13 = vmul.f32 1.442695, %v1856_v31 }
 0x358   : > { %2846 = vpow2.f32 %v1873_v24  ;;  %v1879_v44 = vmul.f32 1.442695, %v1854_v42  ;;  %v1887_v48 = vmul.f32 1.442695, %v1858_v23  ;;  %v1891_v24 = vmul.f32 1.442695, %v1860_v8 }
 0x359   : > { %v3629_v38 = vpop.eup %2828  ;;  %2848 = vpow2.f32 %v1875_v52 }
 0x35a   : > { %v3632_v50 = vpop.eup %2830  ;;  %1910 = vperm.xlu1 %2754, %v3629_v38   ;;  %2850 = vpow2.f32 %v1877_v55 }
 0x35b   : > { %1913 = vperm.xlu0 %2755, %v3632_v50   ;;  %v3638_v2 = vpop.eup %2832  ;;  %2852 = vpow2.f32 %v1879_v44 }
 0x35c   : > { %v3644_v19 = vpop.eup %2834  ;;  %2854 = vpow2.f32 %v1883_v13 }
 0x35d   : > { %v3647_v41 = vpop.eup %2836  ;;  %2856 = vpow2.f32 %v1887_v48 }
 0x35e   : > { %1916 = vperm.xlu1 %2754, %v3638_v2   ;;  %v3651_v46 = vpop.eup %2838  ;;  %2858 = vpow2.f32 %v1891_v24 }
 0x35f   : > { %1940 = vperm.xlu0 %2755, %v3647_v41   ;;  %v3654_v11 = vpop.eup %2840 }
 0x360   : > { %v3658_v47 = vpop.eup %2842 }
 0x361   : > { %v3661_v61 = vpop.eup %2844 }
 0x362   : > { %1919 = vperm.xlu1 %2754, %v3644_v19   ;;  %v3666_v43 = vpop.eup %2846 }
 0x363   : > { %1946 = vperm.xlu0 %2755, %v3654_v11   ;;  %v3671_v39 = vpop.eup %2848 }
 0x364   : > { %v3675_v54 = vpop.eup %2850 }
 0x365   : > { %v3678_v60 = vpop.eup %2852 }
 0x366   : > { %1922 = vperm.xlu1 %2754, %v3651_v46   ;;  %v3681_v1 = vpop.eup %2854 }
 0x367   : > { %1952 = vperm.xlu0 %2755, %v3661_v61   ;;  %v3684_v5 = vpop.eup %2856 }
 0x368   : > { %v3687_v30 = vpop.eup %2858 }
 0x36a   : > { %1925 = vperm.xlu1 %2754, %v3658_v47  }
 0x36e   : > { %1928 = vperm.xlu1 %2754, %v3666_v43  }
 0x372   : > { %1931 = vperm.xlu1 %2754, %v3671_v39  }
 0x376   : > { %1934 = vperm.xlu1 %2754, %v3675_v54  }
 0x37a   : > { %1937 = vperm.xlu1 %2754, %v3678_v60  }
 0x37e   : > { %1943 = vperm.xlu1 %2754, %v3681_v1  }
 0x382   : > { %1949 = vperm.xlu1 %2754, %v3684_v5  }
 0x386   : > { %1955 = vperm.xlu1 %2754, %v3687_v30  }
 0x3d9   : > { %v1911_v17 = vpop.permute.xlu1 %1910 }
 0x3da   : > { %v1914_v23 = vpop.permute.xlu0 %1913  ;;  %v1960_v33 = vrot.slane %v1911_v17, %v3528_v45 }
 0x3db   : > { %v1964_v18 = vrot.slane %v1914_v23, %v3523_v20 }
 0x3dd   : > { %v1917_v52 = vpop.permute.xlu1 %1916  ;;  %v1965_v17 = vsel %vm1720_vm1, %v1964_v18, %v1960_v33 }
 0x3de   : > { %v1941_v48 = vpop.permute.xlu0 %1940  ;;  %v1969_v22 = vrot.slane %v1917_v52, %v3528_v45 }
 0x3df   : > { %v2005_v52 = vrot.slane %v1941_v48, %v3528_v45 }
 0x3e1   : > { %v1920_v42 = vpop.permute.xlu1 %1919 }
 0x3e2   : > { %v1973_v12 = vrot.slane %v1920_v42, %v3523_v20  ;;  %v1947_v9 = vpop.permute.xlu0 %1946 }
 0x3e4   : > { %v1974_v56 = vsel %vm1720_vm1, %v1973_v12, %v1969_v22 }
 0x3e5   : > { %v1923_v55 = vpop.permute.xlu1 %1922  ;;  %v2029_v22 = vsel %vm1785_vm10, %v1974_v56, %v1965_v17 }
 0x3e6   : > { %v1978_v21 = vrot.slane %v1923_v55, %v3528_v45  ;;  %v1953_v12 = vpop.permute.xlu0 %1952 }
 0x3e9   : > { %v1926_v31 = vpop.permute.xlu1 %1925 }
 0x3ea   : > { %v1982_v37 = vrot.slane %v1926_v31, %v3523_v20 }
 0x3ec   : > { %v1983_v31 = vsel %vm1720_vm1, %v1982_v37, %v1978_v21 }
 0x3ed   : > { %v1929_v44 = vpop.permute.xlu1 %1928  ;;  %v2030_v21 = vsel %vm1787_vm11, %v1983_v31, %v2029_v22 }
 0x3ee   : > { %v1987_v42 = vrot.slane %v1929_v44, %v3528_v45 }
 0x3f1   : > { %v1932_v13 = vpop.permute.xlu1 %1931 }
 0x3f2   : > { %v1991_v10 = vrot.slane %v1932_v13, %v3523_v20 }
 0x3f4   : > { %v1992_v13 = vsel %vm1720_vm1, %v1991_v10, %v1987_v42  ;;  %v2023_v10 = vrot.slane %v1953_v12, %v3528_v45  ;;  %v3867_v12 = vsub.s32 6, %v2925_v3 }
 0x3f5   : > { %v1935_v8 = vpop.permute.xlu1 %1934  ;;  %v2031_v44 = vsel %vm1789_vm12, %v1992_v13, %v2030_v21 }
 0x3f6   : > { %v1996_v23 = vrot.slane %v1935_v8, %v3528_v45 }
 0x3f9   : > { %v1938_v24 = vpop.permute.xlu1 %1937 }
 0x3fa   : > { %v2000_v15 = vrot.slane %v1938_v24, %v3523_v20  ;;  %v2014_v24 = vrot.slane %v1947_v9, %v3528_v45 }
 0x3fd   : > { %v1944_v36 = vpop.permute.xlu1 %1943 }
 0x3fe   : > { %v2009_v32 = vrot.slane %v1944_v36, %v3523_v20  ;;  %v2001_v36 = vsel %vm1720_vm1, %v2000_v15, %v1996_v23 }
 0x400   : > { %v2010_v37 = vsel %vm1720_vm1, %v2009_v32, %v2005_v52 }
 0x401   : > { %v1950_v0 = vpop.permute.xlu1 %1949 }
 0x402   : > { %v2018_v55 = vrot.slane %v1950_v0, %v3523_v20  ;;  %v2032_v0 = vsel %vm1791_vm13, %v2001_v36, %v2031_v44 }
 0x403   : > { %v2033_v56 = vsel %vm1793_vm14, %v2010_v37, %v2032_v0  ;;  %v3869_v0 = vmax.f32 %v3379_v14, 0.0  ;;  %v3875_v14 = vmax.f32 %v3397_v28, 0.0 }
 0x404   : > { %v2019_v18 = vsel %vm1720_vm1, %v2018_v55, %v2014_v24 }
 0x405   : > { %v1956_v33 = vpop.permute.xlu1 %1955  ;;  %v2034_v15 = vsel %vm1795_vm15, %v2019_v18, %v2033_v56 }
 0x406   : > { %v2027_v9 = vrot.slane %v1956_v33, %v3523_v20 }
 0x408   : > { %v2028_v8 = vsel %vm1720_vm1, %v2027_v9, %v2023_v10  ;;  %v3870_v9 = vmax.f32 %v3403_v7, 0.0 }
 0x409   : > { %v2035_v48 = vsel %vm1797_vm0, %v2028_v8, %v2034_v15  ;;  %v3872_v15 = vmax.f32 %v3400_v29, 0.0  ;;  %v3877_v29 = vmax.f32 %v3427_v16, 0.0 }
 0x40a   : > { %v2037_v32 = vsel %vm1800_vm3, %v2035_v48, 0.0 }
 0x40b   : > { %2038 = vadd.xlane.f32.xlu0 %v2037_v32 }
 0x498   : > { %v2039_v42 = vpop.xlane.xlu0 %2038 }
 0x499   : > { %2860 = vrcp.f32 %v2039_v42  ;;  %v3873_v42 = vmax.f32 %v3370_v63, 0.0 }
 0x4a3   : > { %v2861_v31 = vpop.eup %2860 }
 0x4a4   : > { %v2061_v45 = vrot.slane %v2861_v31, %v1823_v27  ;;  %v2045_v20 = vrot.slane %v2861_v31, %v1807_v40  ;;  %v2073_v52 = vrot.slane %v2861_v31, %v1835_v51  ;;  %v2049_v24 = vrot.slane %v2861_v31, %v1811_v49 }
 0x4a5   : > { %v2069_v36 = vrot.slane %v2861_v31, %v3867_v12 }
 0x4a6   : > { %v2090_v23 = vmul.f32 %v3675_v54, %v2061_v45  ;;  %v2082_v17 = vmul.f32 %v3629_v38, %v2045_v20  ;;  %v2096_v13 = vmul.f32 %v3661_v61, %v2073_v52  ;;  %v2083_v55 = vmul.f32 %v3632_v50, %v2045_v20 }
 0x4a7   : > { %v2084_v40 = vmul.f32 %v3638_v2, %v2049_v24  ;;  %v2085_v27 = vmul.f32 %v3644_v19, %v2049_v24  ;;  %v2053_v38 = vrot.slane %v2861_v31, %v1815_v35  ;;  %v3865_v50 = vsub.s32 3, %v2925_v3 }
 0x4a8   : > { %2140 = vperm.xlu0 %2755, %v2090_v23   ;;  %2100 = vperm.xlu1 %2754, %v2082_v17   ;;  %v2091_v19 = vmul.f32 %v3678_v60, %v2061_v45  ;;  %v3866_v35 = vsub.s32 5, %v2925_v3  ;;  %v2097_v60 = vmul.f32 %v3687_v30, %v2073_v52  ;;  %v3868_v3 = vmax.f32 %v3376_v6, 0.0 }
 0x4a9   : > { %v2086_v51 = vmul.f32 %v3651_v46, %v2053_v38  ;;  %v2087_v61 = vmul.f32 %v3658_v47, %v2053_v38  ;;  %v2057_v54 = vrot.slane %v2861_v31, %v3865_v50  ;;  %v3871_v30 = vmax.f32 %v3373_v4, 0.0 }
 0x4aa   : > { %v2065_v22 = vrot.slane %v2861_v31, %v3866_v35  ;;  %v3874_v6 = vmax.f32 %v3394_v25, 0.0  ;;  %v3876_v4 = vmax.f32 %v3418_v26, 0.0  ;;  %v3879_v35 = vmax.f32 %v3424_v59, 0.0 }
 0x4ab   : > { %v2088_v49 = vmul.f32 %v3666_v43, %v2057_v54  ;;  %v2089_v2 = vmul.f32 %v3671_v39, %v2057_v54  ;;  %v2094_v43 = vmul.f32 %v3654_v11, %v2069_v36  ;;  %v2095_v39 = vmul.f32 %v3684_v5, %v2069_v36 }
 0x4ac   : > { %2170 = vperm.xlu0 %2755, %v2096_v13   ;;  %2105 = vperm.xlu1 %2754, %v2083_v55   ;;  %v2092_v46 = vmul.f32 %v3647_v41, %v2065_v22  ;;  %v2093_v47 = vmul.f32 %v3681_v1, %v2065_v22  ;;  %v3880_v59 = vmax.f32 %v3442_v57, 0.0 }
 0x4b0   : > { %2110 = vperm.xlu1 %2754, %v2084_v40  }
 0x4b4   : > { %2115 = vperm.xlu1 %2754, %v2085_v27  }
 0x4b8   : > { %2120 = vperm.xlu1 %2754, %v2086_v51  }
 0x4bc   : > { %2125 = vperm.xlu1 %2754, %v2087_v61  }
 0x4c0   : > { %2130 = vperm.xlu1 %2754, %v2088_v49  }
 0x4c4   : > { %2135 = vperm.xlu1 %2754, %v2089_v2  }
 0x4c8   : > { %2145 = vperm.xlu1 %2754, %v2091_v19   ;;  %v3878_v19 = vmax.f32 %v3421_v34, 0.0 }
 0x4cc   : > { %2150 = vperm.xlu1 %2754, %v2092_v46  }
 0x4d0   : > { %2155 = vperm.xlu1 %2754, %v2093_v47  }
 0x4d4   : > { %2160 = vperm.xlu1 %2754, %v2094_v43  }
 0x4d8   : > { %2165 = vperm.xlu1 %2754, %v2095_v39  }
 0x4dc   : > { %2175 = vperm.xlu1 %2754, %v2097_v60  }
 0x527   : > { %v2101_v21 = vpop.permute.xlu1 %2100  ;;  %v2141_v32 = vpop.permute.xlu0 %2140 }
 0x528   : > { %v2178_v31 = vmul.f32 %v2101_v21, %v3873_v42  ;;  %v2186_v13 = vmul.f32 %v2141_v32, %v3876_v4 }
 0x52b   : > { %v2106_v37 = vpop.permute.xlu1 %2105 }
 0x52c   : > { %v2179_v11 = vmul.f32 %v2106_v37, %v3869_v0  ;;  %v3881_v0 = vmax.f32 %v3451_v53, 0.0 }
 0x52e   : > { %v2194_v7 = vadd.f32 %v2179_v11, %v2178_v31 }
 0x52f   : > { %v2111_v44 = vpop.permute.xlu1 %2110 }
 0x530   : > { %v2180_v8 = vmul.f32 %v2111_v44, %v3871_v30  ;;  %v2195_v27 = vrot.slane %v2194_v7, 4 }
 0x532   : > { %v2196_v28 = vadd.f32 %v2195_v27, %v2194_v7 }
 0x533   : > { %v2116_v41 = vpop.permute.xlu1 %2115 }
 0x534   : > { %v2181_v10 = vmul.f32 %v2116_v41, %v3868_v3  ;;  %v2197_v12 = vrot.slane %v2196_v28, 2 }
 0x536   : > { %v2201_v20 = vadd.f32 %v2181_v10, %v2180_v8  ;;  %v2198_v41 = vadd.f32 %v2197_v12, %v2196_v28  ;;  %v3882_v8 = vmax.f32 %v3445_v58, 0.0 }
 0x537   : > { %v2121_v18 = vpop.permute.xlu1 %2120 }
 0x538   : > { %v2182_v45 = vmul.f32 %v2121_v18, %v3874_v6  ;;  %v2202_v40 = vrot.slane %v2201_v20, 4  ;;  %v2199_v42 = vrot.slane %v2198_v41, 1 }
 0x53a   : > { %v2203_v50 = vadd.f32 %v2202_v40, %v2201_v20 }
 0x53b   : > { %v2126_v33 = vpop.permute.xlu1 %2125 }
 0x53c   : > { %v2183_v5 = vmul.f32 %v2126_v33, %v3870_v9  ;;  %v2204_v46 = vrot.slane %v2203_v50, 2 }
 0x53e   : > { %v2208_v17 = vadd.f32 %v2183_v5, %v2182_v45  ;;  %v2205_v37 = vadd.f32 %v2204_v46, %v2203_v50  ;;  %v3883_v45 = vmax.f32 %v3448_v62, 0.0 }
 0x53f   : > { %v2131_v1 = vpop.permute.xlu1 %2130 }
 0x540   : > { %v2184_v23 = vmul.f32 %v2131_v1, %v3875_v14  ;;  %v2209_v38 = vrot.slane %v2208_v17, 4  ;;  %v2171_v1 = vpop.permute.xlu0 %2170  ;;  %v2206_v5 = vrot.slane %v2205_v37, 1 }
 0x542   : > { %v2210_v54 = vadd.f32 %v2209_v38, %v2208_v17  ;;  %v2207_v14 = vadd.f32 %v2206_v5, %v2205_v37 }
 0x543   : > { %v2136_v56 = vpop.permute.xlu1 %2135 }
 0x544   : > { %v2185_v48 = vmul.f32 %v2136_v56, %v3872_v15  ;;  %v2211_v36 = vrot.slane %v2210_v54, 2  ;;  %v2192_v15 = vmul.f32 %v2171_v1, %v3882_v8 }
 0x546   : > { %v2215_v55 = vadd.f32 %v2185_v48, %v2184_v23  ;;  %v2212_v18 = vadd.f32 %v2211_v36, %v2210_v54 }
 0x547   : > { %v2146_v52 = vpop.permute.xlu1 %2145 }
 0x548   : > { %v2187_v24 = vmul.f32 %v2146_v52, %v3877_v29  ;;  %v2216_v51 = vrot.slane %v2215_v55, 4  ;;  %v2213_v48 = vrot.slane %v2212_v18, 1  ;;  %v2200_v52 = vadd.f32 %v2199_v42, %v2198_v41 }
 0x549   : > { %v2497_v29 = vpack.c.bf16 %v2207_v14, %v2207_v14 }
 0x54a   : > { %v2222_v63 = vadd.f32 %v2187_v24, %v2186_v13  ;;  %v2217_v2 = vadd.f32 %v2216_v51, %v2215_v55  ;;  %v2214_v17 = vadd.f32 %v2213_v48, %v2212_v18  ;;  %v2496_v38 = vpack.c.bf16 %v2200_v52, %v2200_v52 }
 0x54b   : > { %v2151_v25 = vpop.permute.xlu1 %2150  ;;  %v2283_v50 = vunpack.c.l.b16 %v2497_v29 }
 0x54c   : > { %v2223_v61 = vrot.slane %v2222_v63, 4  ;;  %v2188_v26 = vmul.f32 %v2151_v25, %v3878_v19  ;;  %v2218_v39 = vrot.slane %v2217_v2, 2  ;;  %v2498_v27 = vpack.c.bf16 %v2214_v17, %v2214_v17 }
 0x54d   : > { %v2282_v19 = vunpack.c.l.b16 %v2496_v38 }
 0x54e   : > { %v2224_v16 = vadd.f32 %v2223_v61, %v2222_v63  ;;  %v2219_v34 = vadd.f32 %v2218_v39, %v2217_v2  ;;  %v2284_v2 = vunpack.c.l.b16 %v2498_v27 }
 0x54f   : > { %v2156_v49 = vpop.permute.xlu1 %2155  ;;  %v2290_v46 = vsel %vm1785_vm10, %v2283_v50, %v2282_v19 }
 0x550   : > { %v2189_v22 = vmul.f32 %v2156_v49, %v3879_v35  ;;  %v2225_v21 = vrot.slane %v2224_v16, 2  ;;  %v2220_v31 = vrot.slane %v2219_v34, 1  ;;  %v2291_v36 = vsel %vm1787_vm11, %v2284_v2, %v2290_v46 }
 0x552   : > { %v2229_v47 = vadd.f32 %v2189_v22, %v2188_v26  ;;  %v2226_v9 = vadd.f32 %v2225_v21, %v2224_v16  ;;  %v2221_v4 = vadd.f32 %v2220_v31, %v2219_v34 }
 0x553   : > { %v2161_v43 = vpop.permute.xlu1 %2160 }
 0x554   : > { %v2230_v60 = vrot.slane %v2229_v47, 4  ;;  %v2190_v10 = vmul.f32 %v2161_v43, %v3880_v59  ;;  %v2227_v57 = vrot.slane %v2226_v9, 1  ;;  %v2499_v62 = vpack.c.bf16 %v2221_v4, %v2221_v4 }
 0x556   : > { %v2231_v44 = vadd.f32 %v2230_v60, %v2229_v47  ;;  %v2228_v55 = vadd.f32 %v2227_v57, %v2226_v9  ;;  %v2285_v26 = vunpack.c.l.b16 %v2499_v62 }
 0x557   : > { %v2166_v33 = vpop.permute.xlu1 %2165 }
 0x558   : > { %v2232_v3 = vrot.slane %v2231_v44, 2  ;;  %v2191_v11 = vmul.f32 %v2166_v33, %v3881_v0  ;;  %v2500_v61 = vpack.c.bf16 %v2228_v55, %v2228_v55  ;;  %v2292_v39 = vsel %vm1789_vm12, %v2285_v26, %v2291_v36 }
 0x55a   : > { %v2233_v56 = vadd.f32 %v2232_v3, %v2231_v44  ;;  %v2236_v30 = vadd.f32 %v2191_v11, %v2190_v10  ;;  %v2286_v16 = vunpack.c.l.b16 %v2500_v61 }
 0x55b   : > { %v2176_v32 = vpop.permute.xlu1 %2175 }
 0x55c   : > { %v2237_v6 = vrot.slane %v2236_v30, 4  ;;  %v2193_v20 = vmul.f32 %v2176_v32, %v3883_v45  ;;  %v2234_v23 = vrot.slane %v2233_v56, 1  ;;  %v2293_v21 = vsel %vm1791_vm13, %v2286_v16, %v2292_v39 }
 0x55e   : > { %v2238_v53 = vadd.f32 %v2237_v6, %v2236_v30  ;;  %v2243_v7 = vadd.f32 %v2193_v20, %v2192_v15  ;;  %v2235_v24 = vadd.f32 %v2234_v23, %v2233_v56 }
 0x560   : > { %v2239_v13 = vrot.slane %v2238_v53, 2  ;;  %v2244_v58 = vrot.slane %v2243_v7, 4  ;;  %v2501_v28 = vpack.c.bf16 %v2235_v24, %v2235_v24 }
 0x562   : > { %v2240_v40 = vadd.f32 %v2239_v13, %v2238_v53  ;;  %v2245_v63 = vadd.f32 %v2244_v58, %v2243_v7  ;;  %v2287_v47 = vunpack.c.l.b16 %v2501_v28 }
 0x564   : > { %v2241_v25 = vrot.slane %v2240_v40, 1  ;;  %v2246_v51 = vrot.slane %v2245_v63, 2  ;;  %v2294_v37 = vsel %vm1793_vm14, %v2287_v47, %v2293_v21 }
 0x566   : > { %v2242_v54 = vadd.f32 %v2241_v25, %v2240_v40  ;;  %v2247_v49 = vadd.f32 %v2246_v51, %v2245_v63 }
 0x568   : > { %v2502_v35 = vpack.c.bf16 %v2242_v54, %v2242_v54  ;;  %v2248_v22 = vrot.slane %v2247_v49, 1 }
 0x56a   : > { %v2249_v12 = vadd.f32 %v2248_v22, %v2247_v49  ;;  %v2288_v43 = vunpack.c.l.b16 %v2502_v35 }
 0x56c   : > { %v2503_v60 = vpack.c.bf16 %v2249_v12, %v2249_v12  ;;  %v2295_v41 = vsel %vm1795_vm15, %v2288_v43, %v2294_v37 }
 0x56e   : > { %v2289_v44 = vunpack.c.l.b16 %v2503_v60 }
 0x570   : > { %v2296_v18 = vsel %vm1797_vm0, %v2289_v44, %v2295_v41 }
 0x571   : > { %v2297_v33 = vpack.c.b16 %v2296_v18, %v2296_v18 }
 0x573   : > { %2299 = vst [vmem:[%s279_s12] sm:$0xf] %v2297_v33 }
 0x574 PF: > { %s16_s21 = sadd.s32 1, %s2868_s21  }
 0x575   : > { %p13_p5 = scmp.ge.s32.totalorder %s16_s21, 5  }
 0x577   :  { %15 = sbr.rel (!%p13_p5) target bundleno = 1 (0x1), region = 76 }

</bundles_post_ra>
